<compile_context>
chip_gen: v7x
topology: tpu7x:2x2x1
jax: 0.10.0
libtpu: 0.0.40
codegen_flags: <defaults>
</compile_context>

<pallas_src>
import functools
import math

import jax
import jax.numpy as jnp
from jax.experimental import pallas as pl
from jax.experimental.pallas import tpu as pltpu


# ----------------------------------------------------------------------------
# helpers
# ----------------------------------------------------------------------------
def _cdiv(a, b):
    return -(-a // b)


def _round_up(a, m):
    return _cdiv(a, m) * m


def _sigmoid(y):
    # Exact sigmoid as a single EUP tanh push (cheaper than exp + reciprocal
    # and avoids the ~1e-3 error of pl.reciprocal(approx=True)).
    return 0.5 * jnp.tanh(0.5 * y) + 0.5


def _choose_batch_tile(batch, block_m):
    """User-row tile. Prefers block_m (full MXU M fill on v6e/v7x) but keeps
    >= 2 grid steps when the batch allows it without dropping the M fill below
    128, so v7x's two TensorCores both get work."""
    padded8 = _round_up(max(batch, 1), 8)
    nsteps = _cdiv(padded8, block_m)
    if nsteps == 1 and padded8 >= 256:
        nsteps = 2
    tm = _round_up(_cdiv(padded8, nsteps), 8)
    return tm, nsteps * tm


def _pick_item_tile(num_items, target):
    """Item-dim tile (K of the first layer / N of the last layer) for the
    tiled path: a multiple of 128 that divides num_items."""
    if num_items <= target or num_items % 128 != 0:
        # TODO(synk): pad the item dimension (x cols, first-layer weight rows,
        # last-layer weight cols + bias) to a multiple of 128 at init so
        # catalogs that are not 128-multiples can also use the tiled path.
        return num_items
    t = (min(target, num_items) // 128) * 128
    while num_items % t != 0:
        t -= 128
    return t


def _param_bytes(layers):
    return sum(w.size * w.dtype.itemsize + b.size * b.dtype.itemsize
               for w, b in layers)


def _vmem_limit(block_bytes, resident_bytes):
    # The pipeline double-buffers every block; x2 everything + headroom for
    # compiler-internal scratch.  Floor at the 32 MiB default scoped limit.
    need = 2 * (block_bytes + resident_bytes) + (4 << 20)
    return int(max(need, 32 << 20))


# ----------------------------------------------------------------------------
# fused MLP kernel (all layers resident in VMEM) -- used for the whole AE when
# it fits, and for the small middle layers in the tiled path.
# ----------------------------------------------------------------------------
def _make_fused_mlp_kernel(n_layers, extra_sigmoid, compute_dtype):
    def kernel(x_ref, *args):
        *wb_refs, o_ref = args
        h = x_ref[...]                       # already compute_dtype
        for i in range(n_layers):
            w = wb_refs[2 * i][...]          # pre-cast compute_dtype weights
            b = wb_refs[2 * i + 1][...]      # f32 bias
            y = jnp.dot(h.astype(compute_dtype), w,
                        preferred_element_type=jnp.float32)
            h = _sigmoid(y + b)              # layer + self.act, f32
        if extra_sigmoid:
            h = _sigmoid(h)                  # implicit-feedback sigmoid
        o_ref[...] = h.astype(o_ref.dtype)
    return kernel


def _fused_mlp(x, layers, extra_sigmoid, *, tm, compute_dtype, out_dtype):
    padded, d_in = x.shape
    d_out = layers[-1][0].shape[1]

    in_specs = [pl.BlockSpec((tm, d_in), lambda i: (i, 0))]
    flat = []
    for w, b in layers:
        di, do = w.shape
        # Full-array blocks pinned to (0, 0): each weight/bias is DMA'd once
        # and stays VMEM-resident across all batch-tile grid steps.
        in_specs.append(pl.BlockSpec((di, do), lambda i: (0, 0)))
        in_specs.append(pl.BlockSpec((1, do), lambda i: (0, 0)))
        flat += [w, b]

    out_isz = jnp.dtype(out_dtype).itemsize
    params_b = _param_bytes(layers)
    flops = 2 * padded * sum(w.shape[0] * w.shape[1] for w, _ in layers)
    trans = padded * sum(w.shape[1] for w, _ in layers)
    if extra_sigmoid:
        trans += padded * d_out
    bytes_acc = x.size * x.dtype.itemsize + params_b + padded * d_out * out_isz
    block_bytes = tm * d_in * x.dtype.itemsize + tm * d_out * out_isz

    return pl.pallas_call(
        _make_fused_mlp_kernel(len(layers), extra_sigmoid, compute_dtype),
        out_shape=jax.ShapeDtypeStruct((padded, d_out), out_dtype),
        grid=(padded // tm,),
        in_specs=in_specs,
        out_specs=pl.BlockSpec((tm, d_out), lambda i: (i, 0)),
        compiler_params=pltpu.CompilerParams(
            dimension_semantics=("parallel",),
            vmem_limit_bytes=_vmem_limit(block_bytes, params_b)),
        cost_estimate=pl.CostEstimate(
            flops=flops, transcendentals=trans, bytes_accessed=bytes_acc),
    )(x, *flat)


# ----------------------------------------------------------------------------
# K-tiled first layer: grid (batch_tiles, K_tiles) reduction over the item dim
# with an f32 VMEM accumulator.
# ----------------------------------------------------------------------------
def _first_layer_kernel(x_ref, w_ref, b_ref, o_ref, acc_ref):
    k = pl.program_id(1)

    @pl.when(k == 0)
    def _():
        acc_ref[...] = jnp.zeros_like(acc_ref)

    acc_ref[...] += jnp.dot(x_ref[...], w_ref[...],
                            preferred_element_type=jnp.float32)

    @pl.when(k == pl.num_programs(1) - 1)
    def _():
        o_ref[...] = _sigmoid(acc_ref[...] + b_ref[...]).astype(o_ref.dtype)


def _first_layer_tiled(x, layer, *, tm, tk, out_dtype):
    padded, num_items = x.shape
    w, b = layer
    d_out = w.shape[1]
    out_isz = jnp.dtype(out_dtype).itemsize
    block_bytes = (tm * tk * x.dtype.itemsize + tk * d_out * w.dtype.itemsize
                   + b.size * b.dtype.itemsize + tm * d_out * out_isz
                   + tm * d_out * 4)
    return pl.pallas_call(
        _first_layer_kernel,
        out_shape=jax.ShapeDtypeStruct((padded, d_out), out_dtype),
        grid=(padded // tm, num_items // tk),
        in_specs=[
            pl.BlockSpec((tm, tk), lambda i, k: (i, k)),
            pl.BlockSpec((tk, d_out), lambda i, k: (k, 0)),
            pl.BlockSpec((1, d_out), lambda i, k: (0, 0)),
        ],
        out_specs=pl.BlockSpec((tm, d_out), lambda i, k: (i, 0)),
        scratch_shapes=[pltpu.VMEM((tm, d_out), jnp.float32)],
        compiler_params=pltpu.CompilerParams(
            dimension_semantics=("parallel", "arbitrary"),
            vmem_limit_bytes=_vmem_limit(block_bytes, 0)),
        cost_estimate=pl.CostEstimate(
            flops=2 * padded * num_items * d_out,
            transcendentals=padded * d_out,
            bytes_accessed=(x.size * x.dtype.itemsize
                            + w.size * w.dtype.itemsize
                            + b.size * b.dtype.itemsize
                            + padded * d_out * out_isz)),
    )(x, w, b)


# ----------------------------------------------------------------------------
# N-tiled last layer: grid (batch_tiles, N_tiles) over the item output dim;
# output blocks stay lane-dense (tn multiple of 128).
# ----------------------------------------------------------------------------
def _make_last_layer_kernel(implicit):
    def kernel(h_ref, w_ref, b_ref, o_ref):
        y = jnp.dot(h_ref[...], w_ref[...], preferred_element_type=jnp.float32)
        y = _sigmoid(y + b_ref[...])
        if implicit:
            y = _sigmoid(y)
        o_ref[...] = y.astype(o_ref.dtype)
    return kernel


def _last_layer_tiled(h, layer, implicit, *, tm, tn, out_dtype):
    padded, d_in = h.shape
    w, b = layer
    num_items = w.shape[1]
    out_isz = jnp.dtype(out_dtype).itemsize
    block_bytes = (tm * d_in * h.dtype.itemsize + d_in * tn * w.dtype.itemsize
                   + tn * b.dtype.itemsize + tm * tn * out_isz)
    return pl.pallas_call(
        _make_last_layer_kernel(implicit),
        out_shape=jax.ShapeDtypeStruct((padded, num_items), out_dtype),
        grid=(padded // tm, num_items // tn),
        in_specs=[
            pl.BlockSpec((tm, d_in), lambda i, j: (i, 0)),
            pl.BlockSpec((d_in, tn), lambda i, j: (0, j)),
            pl.BlockSpec((1, tn), lambda i, j: (0, j)),
        ],
        out_specs=pl.BlockSpec((tm, tn), lambda i, j: (i, j)),
        compiler_params=pltpu.CompilerParams(
            dimension_semantics=("parallel", "parallel"),
            vmem_limit_bytes=_vmem_limit(block_bytes, 0)),
        cost_estimate=pl.CostEstimate(
            flops=2 * padded * d_in * num_items,
            transcendentals=padded * num_items * (2 if implicit else 1),
            bytes_accessed=(h.size * h.dtype.itemsize
                            + w.size * w.dtype.itemsize
                            + b.size * b.dtype.itemsize
                            + padded * num_items * out_isz)),
    )(h, w, b)


# ----------------------------------------------------------------------------
# forward
# ----------------------------------------------------------------------------
def ae_forward_pallas(x, layers, implicit, *, block_m=256,
                      compute_dtype=jnp.bfloat16,
                      fused_vmem_budget_bytes=48 * 1024 * 1024,
                      item_tile_target=512):
    """AE forward.  `layers` = [(w_t, b), ...] with w_t:(d_in,d_out) already in
    compute_dtype and b:(1,d_out) in float32."""
    batch, num_items = x.shape
    assert layers[0][0].shape[0] == num_items
    assert layers[-1][0].shape[1] == num_items
    out_dtype = x.dtype

    tm, padded = _choose_batch_tile(batch, block_m)

    # Cast the input once (halves activation DMA when compute_dtype is bf16)
    # and pad the ragged batch tail up to a tile multiple (all inside jit).
    xc = x.astype(compute_dtype)
    if padded != batch:
        xc = jnp.pad(xc, ((0, padded - batch), (0, 0)))

    fused_need = 2 * (tm * num_items * (xc.dtype.itemsize
                                        + jnp.dtype(out_dtype).itemsize)
                      + _param_bytes(layers))

    if fused_need <= fused_vmem_budget_bytes or len(layers) < 2:
        # Everything (all layers + implicit sigmoid) in ONE pallas_call:
        # intermediates never leave VMEM/vregs, weights stay VMEM-resident.
        out = _fused_mlp(xc, layers, implicit, tm=tm,
                         compute_dtype=compute_dtype, out_dtype=out_dtype)
    else:
        # Realistic num_items: the (tm, num_items) activation tiles plus the
        # first/last weights blow past the VMEM budget (mandatory on v7x's
        # 64 MiB).  K-tile the first layer, N-tile the last, fuse the rest.
        t_items = _pick_item_tile(num_items, item_tile_target)
        h = _first_layer_tiled(xc, layers[0], tm=tm, tk=t_items,
                               out_dtype=compute_dtype)
        mid = layers[1:-1]
        if mid:
            h = _fused_mlp(h, mid, False, tm=tm,
                           compute_dtype=compute_dtype,
                           out_dtype=compute_dtype)
        out = _last_layer_tiled(h, layers[-1], implicit, tm=tm, tn=t_items,
                                out_dtype=out_dtype)

    return out[:batch] if padded != batch else out


def init_linear_params(key, d_in, d_out, dtype=jnp.float32):
    """nn.Linear-style U(-1/sqrt(fan_in), 1/sqrt(fan_in)) init.
    Weight is returned pre-transposed to (d_in, d_out); bias is (1, d_out)."""
    kw, kb = jax.random.split(key)
    bound = 1.0 / math.sqrt(d_in)
    w_t = jax.random.uniform(kw, (d_in, d_out), dtype, minval=-bound, maxval=bound)
    b = jax.random.uniform(kb, (1, d_out), dtype, minval=-bound, maxval=bound)
    return w_t, b


class AEPallas:
    """JAX/Pallas equivalent of the PyTorch AE module's forward pass."""

    def __init__(self, num_users, num_items, hidden_dims, implicit=False,
                 seed=0, compute_dtype=jnp.bfloat16, block_m=256,
                 fused_vmem_budget_bytes=48 * 1024 * 1024):
        self.num_users = num_users
        self.num_items = num_items
        self.implicit = implicit
        self.compute_dtype = compute_dtype
        hidden_dims = ([hidden_dims] if isinstance(hidden_dims, int)
                       else list(hidden_dims))
        self.hidden_dims = hidden_dims

        hiddens = [num_items] + hidden_dims
        assert len(hiddens) > 1

        key = jax.random.PRNGKey(seed)
        n_enc = len(hiddens) - 1
        keys = jax.random.split(key, 2 * n_enc)
        self.encoder = [init_linear_params(keys[i], hiddens[i], hiddens[i + 1])
                        for i in range(n_enc)]
        hid_rev = hiddens[::-1]
        self.decoder = [init_linear_params(keys[n_enc + i], hid_rev[i],
                                           hid_rev[i + 1])
                        for i in range(n_enc)]

        # Cast the matmul operands (weights) to compute_dtype ONCE here rather
        # than per grid step inside the kernel; biases stay f32 (they are
        # added to the f32 accumulator).
        self._kernel_layers = [(w.astype(compute_dtype), b.astype(jnp.float32))
                               for w, b in self.encoder + self.decoder]

        # jit the whole pad + pallas_call(s) + slice pipeline.
        self._forward = jax.jit(functools.partial(
            ae_forward_pallas,
            implicit=implicit,
            block_m=block_m,
            compute_dtype=compute_dtype,
            fused_vmem_budget_bytes=fused_vmem_budget_bytes,
        ))

    def __call__(self, x):
        return self._forward(x, self._kernel_layers)


def ae_reference(model, x):
    """Pure-JAX reference mirroring the kernel's operand dtype (weights and
    activations cast to compute_dtype, f32 accumulation / bias / sigmoid)."""
    cd = model.compute_dtype
    h = x
    for w, b in model.encoder + model.decoder:
        y = jnp.dot(h.astype(cd), w.astype(cd),
                    preferred_element_type=jnp.float32)
        h = jax.nn.sigmoid(y + b)
    if model.implicit:
        h = jax.nn.sigmoid(h)
    return h.astype(x.dtype)


if __name__ == "__main__":
    # Test 1: toy shapes -> fully fused single-kernel path (batch split into
    # two 128-row tiles so both v7x TensorCores get work).
    batch, num_items, hidden_dims = 256, 256, [128, 64]
    model = AEPallas(batch, num_items, hidden_dims, implicit=True, seed=0)
    x = jax.random.uniform(jax.random.PRNGKey(0), (batch, num_items),
                           jnp.float32)
    out = jax.block_until_ready(model(x))
    ref = ae_reference(model, x)
    assert out.shape == (batch, num_items), out.shape
    err = float(jnp.max(jnp.abs(out - ref)))
    assert jnp.allclose(out, ref, atol=2e-3, rtol=2e-3), (
        f"fused path mismatch: max abs diff = {err}")

    # Test 2: a tiny forced VMEM budget exercises the K-tiled first layer /
    # N-tiled last layer path (what realistic num_items needs on v7x), plus a
    # ragged (non-power-of-two) batch.
    model2 = AEPallas(200, 1024, [128, 64], implicit=False, seed=1,
                      fused_vmem_budget_bytes=1 << 20)
    x2 = jax.random.uniform(jax.random.PRNGKey(1), (200, 1024), jnp.float32)
    out2 = jax.block_until_ready(model2(x2))
    ref2 = ae_reference(model2, x2)
    assert out2.shape == (200, 1024), out2.shape
    err2 = float(jnp.max(jnp.abs(out2 - ref2)))
    assert jnp.allclose(out2, ref2, atol=2e-3, rtol=2e-3), (
        f"tiled path mismatch: max abs diff = {err2}")

    print("KERNEL_OK")
</pallas_src>

<mosaic_0001>
module attributes {stable_mosaic.version = 11 : i64} {
  func.func @kernel(%arg0: i32, %arg1: memref<128x256xbf16, #tpu.memory_space<vmem>>, %arg2: memref<256x128xbf16, #tpu.memory_space<vmem>>, %arg3: memref<1x128xf32, #tpu.memory_space<vmem>>, %arg4: memref<128x64xbf16, #tpu.memory_space<vmem>>, %arg5: memref<1x64xf32, #tpu.memory_space<vmem>>, %arg6: memref<64x128xbf16, #tpu.memory_space<vmem>>, %arg7: memref<1x128xf32, #tpu.memory_space<vmem>>, %arg8: memref<128x256xbf16, #tpu.memory_space<vmem>>, %arg9: memref<1x256xf32, #tpu.memory_space<vmem>>, %arg10: memref<128x256xf32, #tpu.memory_space<vmem>>) attributes {dimension_semantics = [#tpu.dimension_semantics<parallel>], iteration_bounds = array<i64: 2>, scalar_prefetch = 0 : i64, scratch_operands = 0 : i64, tpu.core_type = #tpu.core_type<tc>, window_params = [{transform_indices = @transform_0, window_bounds = array<i64: 128, 256>}, {pipeline_mode = #tpu.pipeline_mode<synchronous>, transform_indices = @transform_1, window_bounds = array<i64: 256, 128>}, {pipeline_mode = #tpu.pipeline_mode<synchronous>, transform_indices = @transform_2, window_bounds = array<i64: 1, 128>}, {pipeline_mode = #tpu.pipeline_mode<synchronous>, transform_indices = @transform_3, window_bounds = array<i64: 128, 64>}, {pipeline_mode = #tpu.pipeline_mode<synchronous>, transform_indices = @transform_4, window_bounds = array<i64: 1, 64>}, {pipeline_mode = #tpu.pipeline_mode<synchronous>, transform_indices = @transform_5, window_bounds = array<i64: 64, 128>}, {pipeline_mode = #tpu.pipeline_mode<synchronous>, transform_indices = @transform_6, window_bounds = array<i64: 1, 128>}, {pipeline_mode = #tpu.pipeline_mode<synchronous>, transform_indices = @transform_7, window_bounds = array<i64: 128, 256>}, {pipeline_mode = #tpu.pipeline_mode<synchronous>, transform_indices = @transform_8, window_bounds = array<i64: 1, 256>}, {transform_indices = @transform_9, window_bounds = array<i64: 128, 256>}]} {
    %c0 = arith.constant 0 : index
    %c0_0 = arith.constant 0 : index
    %0 = vector.load %arg1[%c0, %c0_0] : memref<128x256xbf16, #tpu.memory_space<vmem>>, vector<128x256xbf16>
    %c0_1 = arith.constant 0 : index
    %c0_2 = arith.constant 0 : index
    %1 = vector.load %arg2[%c0_1, %c0_2] : memref<256x128xbf16, #tpu.memory_space<vmem>>, vector<256x128xbf16>
    %c0_3 = arith.constant 0 : index
    %c0_4 = arith.constant 0 : index
    %2 = vector.load %arg3[%c0_3, %c0_4] : memref<1x128xf32, #tpu.memory_space<vmem>>, vector<1x128xf32>
    %cst = arith.constant dense<0.000000e+00> : vector<128x128xf32>
    %3 = tpu.matmul %0, %1, %cst {dimension_numbers = #tpu.dot_dimension_numbers<[1], [0], [0], [1], [0, 0, 1, 1], [], []>} : vector<128x256xbf16>, vector<256x128xbf16>, vector<128x128xf32> -> vector<128x128xf32>
    %4 = vector.broadcast %2 : vector<1x128xf32> to vector<128x128xf32>
    %5 = arith.addf %3, %4 : vector<128x128xf32>
    %cst_5 = arith.constant 5.000000e-01 : f32
    %6 = vector.broadcast %cst_5 : f32 to vector<128x128xf32>
    %7 = arith.mulf %6, %5 : vector<128x128xf32>
    %8 = math.tanh %7 : vector<128x128xf32>
    %cst_6 = arith.constant 5.000000e-01 : f32
    %9 = vector.broadcast %cst_6 : f32 to vector<128x128xf32>
    %10 = arith.mulf %9, %8 : vector<128x128xf32>
    %cst_7 = arith.constant 5.000000e-01 : f32
    %11 = vector.broadcast %cst_7 : f32 to vector<128x128xf32>
    %12 = arith.addf %10, %11 : vector<128x128xf32>
    %c0_8 = arith.constant 0 : index
    %c0_9 = arith.constant 0 : index
    %13 = vector.load %arg4[%c0_8, %c0_9] : memref<128x64xbf16, #tpu.memory_space<vmem>>, vector<128x64xbf16>
    %c0_10 = arith.constant 0 : index
    %c0_11 = arith.constant 0 : index
    %14 = vector.load %arg5[%c0_10, %c0_11] : memref<1x64xf32, #tpu.memory_space<vmem>>, vector<1x64xf32>
    %15 = arith.truncf %12 : vector<128x128xf32> to vector<128x128xbf16>
    %cst_12 = arith.constant dense<0.000000e+00> : vector<128x64xf32>
    %16 = tpu.matmul %15, %13, %cst_12 {dimension_numbers = #tpu.dot_dimension_numbers<[1], [0], [0], [1], [0, 0, 1, 1], [], []>} : vector<128x128xbf16>, vector<128x64xbf16>, vector<128x64xf32> -> vector<128x64xf32>
    %17 = vector.broadcast %14 : vector<1x64xf32> to vector<128x64xf32>
    %18 = arith.addf %16, %17 : vector<128x64xf32>
    %cst_13 = arith.constant 5.000000e-01 : f32
    %19 = vector.broadcast %cst_13 : f32 to vector<128x64xf32>
    %20 = arith.mulf %19, %18 : vector<128x64xf32>
    %21 = math.tanh %20 : vector<128x64xf32>
    %cst_14 = arith.constant 5.000000e-01 : f32
    %22 = vector.broadcast %cst_14 : f32 to vector<128x64xf32>
    %23 = arith.mulf %22, %21 : vector<128x64xf32>
    %cst_15 = arith.constant 5.000000e-01 : f32
    %24 = vector.broadcast %cst_15 : f32 to vector<128x64xf32>
    %25 = arith.addf %23, %24 : vector<128x64xf32>
    %c0_16 = arith.constant 0 : index
    %c0_17 = arith.constant 0 : index
    %26 = vector.load %arg6[%c0_16, %c0_17] : memref<64x128xbf16, #tpu.memory_space<vmem>>, vector<64x128xbf16>
    %c0_18 = arith.constant 0 : index
    %c0_19 = arith.constant 0 : index
    %27 = vector.load %arg7[%c0_18, %c0_19] : memref<1x128xf32, #tpu.memory_space<vmem>>, vector<1x128xf32>
    %28 = arith.truncf %25 : vector<128x64xf32> to vector<128x64xbf16>
    %cst_20 = arith.constant dense<0.000000e+00> : vector<128x128xf32>
    %29 = tpu.matmul %28, %26, %cst_20 {dimension_numbers = #tpu.dot_dimension_numbers<[1], [0], [0], [1], [0, 0, 1, 1], [], []>} : vector<128x64xbf16>, vector<64x128xbf16>, vector<128x128xf32> -> vector<128x128xf32>
    %30 = vector.broadcast %27 : vector<1x128xf32> to vector<128x128xf32>
    %31 = arith.addf %29, %30 : vector<128x128xf32>
    %cst_21 = arith.constant 5.000000e-01 : f32
    %32 = vector.broadcast %cst_21 : f32 to vector<128x128xf32>
    %33 = arith.mulf %32, %31 : vector<128x128xf32>
    %34 = math.tanh %33 : vector<128x128xf32>
    %cst_22 = arith.constant 5.000000e-01 : f32
    %35 = vector.broadcast %cst_22 : f32 to vector<128x128xf32>
    %36 = arith.mulf %35, %34 : vector<128x128xf32>
    %cst_23 = arith.constant 5.000000e-01 : f32
    %37 = vector.broadcast %cst_23 : f32 to vector<128x128xf32>
    %38 = arith.addf %36, %37 : vector<128x128xf32>
    %c0_24 = arith.constant 0 : index
    %c0_25 = arith.constant 0 : index
    %39 = vector.load %arg8[%c0_24, %c0_25] : memref<128x256xbf16, #tpu.memory_space<vmem>>, vector<128x256xbf16>
    %c0_26 = arith.constant 0 : index
    %c0_27 = arith.constant 0 : index
    %40 = vector.load %arg9[%c0_26, %c0_27] : memref<1x256xf32, #tpu.memory_space<vmem>>, vector<1x256xf32>
    %41 = arith.truncf %38 : vector<128x128xf32> to vector<128x128xbf16>
    %cst_28 = arith.constant dense<0.000000e+00> : vector<128x256xf32>
    %42 = tpu.matmul %41, %39, %cst_28 {dimension_numbers = #tpu.dot_dimension_numbers<[1], [0], [0], [1], [0, 0, 1, 1], [], []>} : vector<128x128xbf16>, vector<128x256xbf16>, vector<128x256xf32> -> vector<128x256xf32>
    %43 = vector.broadcast %40 : vector<1x256xf32> to vector<128x256xf32>
    %44 = arith.addf %42, %43 : vector<128x256xf32>
    %cst_29 = arith.constant 5.000000e-01 : f32
    %45 = vector.broadcast %cst_29 : f32 to vector<128x256xf32>
    %46 = arith.mulf %45, %44 : vector<128x256xf32>
    %47 = math.tanh %46 : vector<128x256xf32>
    %cst_30 = arith.constant 5.000000e-01 : f32
    %48 = vector.broadcast %cst_30 : f32 to vector<128x256xf32>
    %49 = arith.mulf %48, %47 : vector<128x256xf32>
    %cst_31 = arith.constant 5.000000e-01 : f32
    %50 = vector.broadcast %cst_31 : f32 to vector<128x256xf32>
    %51 = arith.addf %49, %50 : vector<128x256xf32>
    %cst_32 = arith.constant 5.000000e-01 : f32
    %52 = vector.broadcast %cst_32 : f32 to vector<128x256xf32>
    %53 = arith.mulf %52, %51 : vector<128x256xf32>
    %54 = math.tanh %53 : vector<128x256xf32>
    %cst_33 = arith.constant 5.000000e-01 : f32
    %55 = vector.broadcast %cst_33 : f32 to vector<128x256xf32>
    %56 = arith.mulf %55, %54 : vector<128x256xf32>
    %cst_34 = arith.constant 5.000000e-01 : f32
    %57 = vector.broadcast %cst_34 : f32 to vector<128x256xf32>
    %58 = arith.addf %56, %57 : vector<128x256xf32>
    %c0_35 = arith.constant 0 : index
    %c0_36 = arith.constant 0 : index
    %59 = vector.load %arg10[%c0_35, %c0_36] : memref<128x256xf32, #tpu.memory_space<vmem>>, vector<128x256xf32>
    tpu.vector_store %arg10[%c0_35, %c0_36], %58 {strides = array<i32>} : memref<128x256xf32, #tpu.memory_space<vmem>>, vector<128x256xf32>,
    return
  }
  func.func @transform_0(%arg0: i32) -> (i32, i32) {
    %c0_i32 = arith.constant 0 : i32
    %c0_i32_0 = arith.constant 0 : i32
    return %arg0, %c0_i32 : i32, i32
  }
  func.func @transform_1(%arg0: i32) -> (i32, i32) {
    %c0_i32 = arith.constant 0 : i32
    %c0_i32_0 = arith.constant 0 : i32
    %c0_i32_1 = arith.constant 0 : i32
    return %c0_i32, %c0_i32_0 : i32, i32
  }
  func.func @transform_2(%arg0: i32) -> (i32, i32) {
    %c0_i32 = arith.constant 0 : i32
    %c0_i32_0 = arith.constant 0 : i32
    %c0_i32_1 = arith.constant 0 : i32
    return %c0_i32, %c0_i32_0 : i32, i32
  }
  func.func @transform_3(%arg0: i32) -> (i32, i32) {
    %c0_i32 = arith.constant 0 : i32
    %c0_i32_0 = arith.constant 0 : i32
    %c0_i32_1 = arith.constant 0 : i32
    return %c0_i32, %c0_i32_0 : i32, i32
  }
  func.func @transform_4(%arg0: i32) -> (i32, i32) {
    %c0_i32 = arith.constant 0 : i32
    %c0_i32_0 = arith.constant 0 : i32
    %c0_i32_1 = arith.constant 0 : i32
    return %c0_i32, %c0_i32_0 : i32, i32
  }
  func.func @transform_5(%arg0: i32) -> (i32, i32) {
    %c0_i32 = arith.constant 0 : i32
    %c0_i32_0 = arith.constant 0 : i32
    %c0_i32_1 = arith.constant 0 : i32
    return %c0_i32, %c0_i32_0 : i32, i32
  }
  func.func @transform_6(%arg0: i32) -> (i32, i32) {
    %c0_i32 = arith.constant 0 : i32
    %c0_i32_0 = arith.constant 0 : i32
    %c0_i32_1 = arith.constant 0 : i32
    return %c0_i32, %c0_i32_0 : i32, i32
  }
  func.func @transform_7(%arg0: i32) -> (i32, i32) {
    %c0_i32 = arith.constant 0 : i32
    %c0_i32_0 = arith.constant 0 : i32
    %c0_i32_1 = arith.constant 0 : i32
    return %c0_i32, %c0_i32_0 : i32, i32
  }
  func.func @transform_8(%arg0: i32) -> (i32, i32) {
    %c0_i32 = arith.constant 0 : i32
    %c0_i32_0 = arith.constant 0 : i32
    %c0_i32_1 = arith.constant 0 : i32
    return %c0_i32, %c0_i32_0 : i32, i32
  }
  func.func @transform_9(%arg0: i32) -> (i32, i32) {
    %c0_i32 = arith.constant 0 : i32
    %c0_i32_0 = arith.constant 0 : i32
    return %arg0, %c0_i32 : i32, i32
  }
}

</mosaic_0001>

<bundles_post_ra>
// kernel: ae_forward_pallas.1
= control target key start
LH: loop header
LB: loop body
LE: loop exit
PB: predicated region body
PF: predicated region fallthrough
CT: control target
= control target key end

     0   :  { %14 = vsyncpa [#allocation3], 0  ;;  %s2934_s0 = inlined_call_operand.vmem [shape: bf16[256,256], index: 0, kind: input, shape index: {}]   ;;  %s2935_s1 = inlined_call_operand.vmem [shape: bf16[256,128], index: 1, kind: input, shape index: {}]   ;;  %s2936_s2 = inlined_call_operand.vmem [shape: f32[1,128], index: 2, kind: input, shape index: {}]   ;;  %s2937_s3 = inlined_call_operand.vmem [shape: bf16[128,64], index: 3, kind: input, shape index: {}]   ;;  %s2938_s4 = inlined_call_operand.vmem [shape: f32[1,64], index: 4, kind: input, shape index: {}]   ;;  %s2939_s5 = inlined_call_operand.vmem [shape: bf16[64,128], index: 5, kind: input, shape index: {}]   ;;  %s2940_s6 = inlined_call_operand.vmem [shape: f32[1,128], index: 6, kind: input, shape index: {}]   ;;  %s2941_s7 = inlined_call_operand.vmem [shape: bf16[128,256], index: 7, kind: input, shape index: {}]   ;;  %s2942_s8 = inlined_call_operand.vmem [shape: f32[1,256], index: 8, kind: input, shape index: {}]   ;;  %s2943_s9 = inlined_call_operand.hbm [shape: f32[256,256], index: 9, kind: output, shape index: {}]  }
   0x1   :  { %16 = vsyncpa [#allocation3 + $0x1], 0  ;;  %s2509_s30 = smov 0   ;;  %s2511_s10 = smov 0  }
   0x2   :  { %s2513_s11 = smov 0   ;;  %s2515_s12 = smov 0  }
   0x3 LB: > { %s2530_s13 = sadd.s32 4294967295, %s2453_s12   ;;  %s1797_s14 = sadd.s32 4294967294, %s2453_s12   ;;  %s2453_s12 = sphi %s2515_s12, %s2949_s12   ;;  %s2449_s11 = sphi %s2513_s11, %s2948_s11   ;;  %s2445_s10 = sphi %s2511_s10, %s2947_s10   ;;  %s2441_s30 = sphi %s2509_s30, %s2946_s30  }
   0x4   : > { %s2534_s15 = sadd.s32 1, %s2453_s12   ;;  %s223_s16 = sadd.s32 1, %s2449_s11 }
   0x5   : > { %s220_s17 = ssub.s32 %s2453_s12, %s2534_s15  ;;  %p233_p0 = scmp.ne.s32.totalorder %s2449_s11, %s2445_s10 }
   0x6   : > { %p221_p1 = scmp.eq.s32.totalorder %s220_s17, 0  ;;  %p234_p2 = scmp.eq.s32.totalorder %s2530_s13, 1 }
   0x7   : > { %p239_p3 = scmp.ne.s32.totalorder %s2445_s10, %s2441_s30  ;;  %p240_p4 = scmp.eq.s32.totalorder %s1797_s14, 1 }
   0x8   : > { %s2545_s18 = scalar_select %p221_p1, %s2449_s11, %s223_s16  }
   0x9   : > { %p2547_p5 = por %p234_p2, %p233_p0  ;;  %p2551_p6 = por %p240_p4, %p239_p3 }
   0xa   : > { %p1800_p7 = scmp.ge.s32.totalorder %s2453_s12, 1  ;;  %p292_p8 = scmp.lt.s32.totalorder %s2453_s12, 3 }
   0xc   : > { %p293_p9 = pnand %p1800_p7, %p292_p8 }
   0xd   : > { %v2091_v0 = vld [vmem:[%s2935_s1 + $0x40] sm:$0xff] (!%p293_p9)   ;;  %s1802_s23 = sshll.u32 (!%p293_p9), %s2530_s13, 4  ;;  %v2093_v2 = vld [vmem:[%s2935_s1 + $0x48] sm:$0xff] (!%p293_p9)   ;;  %v2095_v4 = vld [vmem:[%s2935_s1 + $0x50] sm:$0xff] (!%p293_p9)   ;;  %vm1017_vm0 = vcmask (!%p293_p9), 523264   ;;  %s326_s28 = sand.u32 (!%p293_p9), 1, %s2445_s10  }
   0xe   : > { %296 = sbr.rel (%p293_p9) target bundleno = 1094 (0x446), region = 56  ;;  %v2092_v1 = vld [vmem:[%s2935_s1] sm:$0xff] (!%p293_p9)   ;;  %1885 = vmatprep.subr.bf16.mxu0 (!%p293_p9), %v2091_v0  ;;  %2033 = vmatprep.subr.bf16.mxu1 (!%p293_p9), %v2091_v0  ;;  %v2094_v3 = vld [vmem:[%s2935_s1 + $0x8] sm:$0xff] (!%p293_p9)   ;;  %p330_p10 = scmp.lt.s32.totalorder (!%p293_p9), %s1802_s23, 31  ;;  %v2096_v5 = vld [vmem:[%s2935_s1 + $0x10] sm:$0xff] (!%p293_p9)  }
   0xf   : > { %1886 = vmatpush3.bf16.msra.mxu0 (!%p293_p9), %v2092_v1  ;;  %2041 = vmatpush3.bf16.msra.mxu1 (!%p293_p9), %v2092_v1  ;;  %v2097_v6 = vld [vmem:[%s2935_s1 + $0x58] sm:$0xff] (!%p293_p9)   ;;  %v2099_v8 = vld [vmem:[%s2935_s1 + $0x60] sm:$0xff] (!%p293_p9)   ;;  %v2101_v10 = vld [vmem:[%s2935_s1 + $0x68] sm:$0xff] (!%p293_p9)   ;;  %s2829_s29 = sshll.u32 (!%p293_p9), %s326_s28, 8  ;;  %s1884_s14 = sshll.u32 (!%p293_p9), %s2530_s13, 12 }
  0x10   : > { %1887 = vmatprep.subr.bf16.mxu0 (!%p293_p9), %v2093_v2  ;;  %2034 = vmatprep.subr.bf16.mxu1 (!%p293_p9), %v2093_v2  ;;  %v2098_v7 = vld [vmem:[%s2935_s1 + $0x18] sm:$0xff] (!%p293_p9)   ;;  %v2100_v9 = vld [vmem:[%s2935_s1 + $0x20] sm:$0xff] (!%p293_p9)   ;;  %v2102_v12 = vld [vmem:[%s2935_s1 + $0x28] sm:$0xff] (!%p293_p9)   ;;  %s2893_s13 = scalar_lea.sflag (!%p293_p9), [#allocation3], %s326_s28  ;;  %s2456_s25 = smov (!%p293_p9), [#allocation2]  }
  0x11   : > { %v2103_v13 = vld [vmem:[%s2935_s1 + $0x70] sm:$0xff] (!%p293_p9)   ;;  %v2105_v16 = vld [vmem:[%s2935_s1 + $0x78] sm:$0xff] (!%p293_p9)   ;;  %v2131_v32 = vld [vmem:[%s2937_s3] sm:$0xff] (!%p293_p9)   ;;  %s2395_s26 = sshll.u32 (!%p293_p9), %s2456_s25, 4  ;;  %s2396_s26 = int_to_ptr.vmem [resolvable:$false] %s2395_s26 }
  0x12   : > { %v2104_v15 = vld [vmem:[%s2935_s1 + $0x30] sm:$0xff] (!%p293_p9)   ;;  %v2106_v17 = vld [vmem:[%s2935_s1 + $0x38] sm:$0xff] (!%p293_p9)   ;;  %v2132_v33 = vld [vmem:[%s2937_s3 + $0x8] sm:$0xff] (!%p293_p9)  }
  0x13   : > { %1888 = vmatpush3.bf16.msra.mxu0 (!%p293_p9), %v2094_v3  ;;  %2042 = vmatpush3.bf16.msra.mxu1 (!%p293_p9), %v2094_v3  ;;  %v2133_v34 = vld [vmem:[%s2937_s3 + $0x10] sm:$0xff] (!%p293_p9)   ;;  %v2134_v35 = vld [vmem:[%s2937_s3 + $0x18] sm:$0xff] (!%p293_p9)   ;;  %v2135_v36 = vld [vmem:[%s2937_s3 + $0x20] sm:$0xff] (!%p293_p9)  }
  0x14   : > { %1889 = vmatprep.subr.bf16.mxu0 (!%p293_p9), %v2095_v4  ;;  %2035 = vmatprep.subr.bf16.mxu1 (!%p293_p9), %v2095_v4  ;;  %v2136_v37 = vld [vmem:[%s2937_s3 + $0x28] sm:$0xff] (!%p293_p9)   ;;  %v2137_v38 = vld [vmem:[%s2937_s3 + $0x30] sm:$0xff] (!%p293_p9)   ;;  %v2138_v39 = vld [vmem:[%s2937_s3 + $0x38] sm:$0xff] (!%p293_p9)  }
  0x15   : > { %s2951_s23 = smov (!%p330_p10, %s1802_s23), 31  ;;  %v2654_v40 = vld [vmem:[%s2939_s5] sm:$0xff]  }
  0x16   : > { %s1882_s27 = sshll.u32 %s2951_s23, 3  ;;  %v2660_v42 = vld [vmem:[%s2936_s2] ss:$0 sm:$0xff]  ;;  %s2885_s23 = scalar_lea.hbm %s2943_s9, %s1884_s14 }
  0x17   : > { %1890 = vmatpush3.bf16.msra.mxu0 %v2096_v5  ;;  %2043 = vmatpush3.bf16.msra.mxu1 %v2096_v5  ;;  %s2588_s17 = scalar_lea.vmem %s2934_s0, %s1882_s27  ;;  %s2397_s27 = scalar_lea.vmem %s2396_s26, 8192 }
  0x18   : > { %1891 = vmatprep.subr.bf16.mxu0 %v2097_v6  ;;  %2036 = vmatprep.subr.bf16.mxu1 %v2097_v6  ;;  %v2109_v11 = vld [vmem:[%s2588_s17 + $0x4] ss:$8 sps:$4 sm:$0xff]   ;;  %v2107_v18 = vld [vmem:[%s2588_s17] ss:$8 sps:$4 sm:$0xff]   ;;  %v2110_v19 = vld [vmem:[%s2588_s17 + $0x14] ss:$8 sps:$4 sm:$0xff]  }
  0x19   : > { %601 = vmatprep.mubr.bf16.mxu0 %v2109_v11  ;;  %v2118_v14 = vld [vmem:[%s2588_s17 + $0x44] ss:$8 sps:$4 sm:$0xff]   ;;  %v2116_v20 = vld [vmem:[%s2588_s17 + $0x40] ss:$8 sps:$4 sm:$0xff]   ;;  %v2122_v21 = vld [vmem:[%s2588_s17 + $0x54] ss:$8 sps:$4 sm:$0xff]  }
  0x1a   : > { %633 = vmatprep.mubr.bf16.mxu1 %v2118_v14  ;;  %v2112_v22 = vld [vmem:[%s2588_s17 + $0x10] ss:$8 sps:$4 sm:$0xff]   ;;  %v2113_v23 = vld [vmem:[%s2588_s17 + $0x24] ss:$8 sps:$4 sm:$0xff]   ;;  %v2115_v26 = vld [vmem:[%s2588_s17 + $0x20] ss:$8 sps:$4 sm:$0xff]  }
  0x1b   : > { %1892 = vmatpush3.bf16.msra.mxu0 %v2098_v7  ;;  %2044 = vmatpush3.bf16.msra.mxu1 %v2098_v7  ;;  %v2124_v24 = vld [vmem:[%s2588_s17 + $0x50] ss:$8 sps:$4 sm:$0xff]   ;;  %v2125_v25 = vld [vmem:[%s2588_s17 + $0x64] ss:$8 sps:$4 sm:$0xff]   ;;  %v2119_v27 = vld [vmem:[%s2588_s17 + $0x34] ss:$8 sps:$4 sm:$0xff]  }
  0x1c   : > { %1893 = vmatprep.subr.bf16.mxu0 %v2099_v8  ;;  %2037 = vmatprep.subr.bf16.mxu1 %v2099_v8  ;;  %v2127_v28 = vld [vmem:[%s2588_s17 + $0x60] ss:$8 sps:$4 sm:$0xff]   ;;  %v2128_v29 = vld [vmem:[%s2588_s17 + $0x74] ss:$8 sps:$4 sm:$0xff]   ;;  %v2121_v30 = vld [vmem:[%s2588_s17 + $0x30] ss:$8 sps:$4 sm:$0xff]  }
  0x1d   : > { %v2130_v31 = vld [vmem:[%s2588_s17 + $0x70] ss:$8 sps:$4 sm:$0xff]   ;;  %s2834_s17 = scalar_lea.vmem [#allocation2], %s2829_s29 }
  0x1e   : > { %s1735_s16 = sshll.u32 %s2834_s17, 4  ;;  %s2887_s16 = int_to_ptr.vmem [resolvable:$true] %s1735_s16 }
  0x1f   : > { %1894 = vmatpush3.bf16.msra.mxu0 %v2100_v9  ;;  %2045 = vmatpush3.bf16.msra.mxu1 %v2100_v9  ;;  %s2391_s24 = scalar_lea.vmem %s2887_s16, 4096  ;;  %p2398_p0 = scmp.lt.s32.totalorder %s2887_s16, %s2396_s26 }
  0x20   : > { %1895 = vmatprep.subr.bf16.mxu0 %v2101_v10  ;;  %2038 = vmatprep.subr.bf16.mxu1 %v2101_v10  ;;  %p2392_p11 = scmp.ne.s32.totalorder %s2887_s16, %s2391_s24  ;;  %p2399_p1 = scmp.lt.s32.totalorder %s2397_s27, %s2391_s24 }
  0x22   : > { %p2393_p12 = pnand %p2392_p11, %p2547_p5  ;;  %p2400_p2 = por %p2399_p1, %p2398_p0 }
  0x23   : > { %1896 = vmatpush3.bf16.msra.mxu0 %v2102_v12  ;;  %2046 = vmatpush3.bf16.msra.mxu1 %v2102_v12 }
  0x24   : > { %1897 = vmatprep.subr.bf16.mxu0 %v2103_v13  ;;  %2039 = vmatprep.subr.bf16.mxu1 %v2103_v13  ;;  %p2394_p13 = pneg %p2393_p12 }
  0x26   : > { %p2401_p3 = pnand %p2400_p2, %p2394_p13 }
  0x27   : > { %1898 = vmatpush3.bf16.msra.mxu0 %v2104_v15  ;;  %2047 = vmatpush3.bf16.msra.mxu1 %v2104_v15 }
  0x28   : > { %1899 = vmatprep.subr.bf16.mxu0 %v2105_v16  ;;  %2040 = vmatprep.subr.bf16.mxu1 %v2105_v16 }
  0x2b   : > { %1900 = vmatpush3.bf16.msra.mxu0 %v2106_v17  ;;  %2048 = vmatpush3.bf16.msra.mxu1 %v2106_v17 }
  0x2c   : > { %1977 = vmatprep.subr.bf16.mxu1 %v2131_v32 }
  0x2e   : > { %602 = vmatmul.mubr.bf16.vlgmr.msra.gmra.mrb[0].mxu0 %v2107_v18  ;;  %634 = vmatmul.mubr.bf16.vlgmr.msra.gmra.mrb[0].mxu1 %v2116_v20 }
  0x2f   : > { %609 = vmatprep.mubr.bf16.mxu0 %v2110_v19  ;;  %641 = vmatprep.mubr.bf16.mxu1 %v2122_v21 }
  0x30   : > { %1978 = vmatpush3.bf16.msra.mxu1 %v2131_v32 }
  0x31   : > { %1979 = vmatprep.subr.bf16.mxu1 %v2132_v33 }
  0x34   : > { %1980 = vmatpush3.bf16.msra.mxu1 %v2132_v33 }
  0x35   : > { %1981 = vmatprep.subr.bf16.mxu1 %v2133_v34 }
  0x36   : > { %610 = vmatmul.mubr.bf16.gmra.mrb[4].mxu0 %v2112_v22  ;;  %642 = vmatmul.mubr.bf16.gmra.mrb[4].mxu1 %v2124_v24 }
  0x37   : > { %617 = vmatprep.mubr.bf16.mxu0 %v2113_v23  ;;  %649 = vmatprep.mubr.bf16.mxu1 %v2125_v25 }
  0x38   : > { %1982 = vmatpush3.bf16.msra.mxu1 %v2133_v34 }
  0x39   : > { %1983 = vmatprep.subr.bf16.mxu1 %v2134_v35 }
  0x3c   : > { %1984 = vmatpush3.bf16.msra.mxu1 %v2134_v35 }
  0x3d   : > { %1985 = vmatprep.subr.bf16.mxu1 %v2135_v36 }
  0x3e   : > { %618 = vmatmul.mubr.bf16.gmra.mrb[8].mxu0 %v2115_v26  ;;  %650 = vmatmul.mubr.bf16.gmra.mrb[8].mxu1 %v2127_v28 }
  0x3f   : > { %625 = vmatprep.mubr.bf16.mxu0 %v2119_v27  ;;  %657 = vmatprep.mubr.bf16.mxu1 %v2128_v29 }
  0x40   : > { %1986 = vmatpush3.bf16.msra.mxu1 %v2135_v36 }
  0x41   : > { %1987 = vmatprep.subr.bf16.mxu1 %v2136_v37 }
  0x44   : > { %1988 = vmatpush3.bf16.msra.mxu1 %v2136_v37 }
  0x45   : > { %1989 = vmatprep.subr.bf16.mxu1 %v2137_v38 }
  0x46   : > { %626 = vmatmul.mubr.bf16.gmra.mrb[12].mxu0 %v2121_v30  ;;  %658 = vmatmul.mubr.bf16.gmra.mrb[12].mxu1 %v2130_v31 }
  0x48   : > { %1990 = vmatpush3.bf16.msra.mxu1 %v2137_v38 }
  0x49   : > { %1991 = vmatprep.subr.bf16.mxu1 %v2138_v39 }
  0x4c   : > { %1992 = vmatpush3.bf16.msra.mxu1 %v2138_v39 }
  0x4d   : > { %2009 = vmatprep.subr.bf16.mxu1 %v2654_v40 }
 0x101   : > { %v1901_v41 = vpop.f32.mrb[0].mxu0  ;;  %v1925_v44 = vpop.f32.mrb[0].mxu1 }
 0x102   : > { %v1902_v43 = vpop.f32.mrb[1].mxu0  ;;  %v1926_v47 = vpop.f32.mrb[1].mxu1 }
 0x103   : > { %v1903_v45 = vadd.f32 %v1902_v43, %v1901_v41  ;;  %v1904_v46 = vpop.f32.mrb[2].mxu0  ;;  %v1927_v49 = vadd.f32 %v1926_v47, %v1925_v44  ;;  %v1928_v50 = vpop.f32.mrb[2].mxu1 }
 0x104   : > { %v1905_v48 = vpop.f32.mrb[3].mxu0  ;;  %v1929_v53 = vpop.f32.mrb[3].mxu1 }
 0x105   : > { %v604_v51 = vadd.f32 %v1903_v45, %v2660_v42  ;;  %v1906_v52 = vadd.f32 %v1905_v48, %v1904_v46  ;;  %v636_v54 = vadd.f32 %v1927_v49, %v2660_v42  ;;  %v1930_v55 = vadd.f32 %v1929_v53, %v1928_v50 }
 0x107   : > { %v666_v56 = vmul.f32 0.5, %v604_v51  ;;  %v607_v57 = vadd.f32 %v1906_v52, %v2660_v42  ;;  %v674_v58 = vmul.f32 0.5, %v636_v54  ;;  %v639_v59 = vadd.f32 %v1930_v55, %v2660_v42 }
 0x109   : > { %2167 = vtanh.f32 %v666_v56  ;;  %v667_v60 = vmul.f32 0.5, %v607_v57  ;;  %v1907_v61 = vpop.f32.mrb[4].mxu0  ;;  %v675_v63 = vmul.f32 0.5, %v639_v59  ;;  %v1931_v0 = vpop.f32.mrb[4].mxu1 }
 0x10a   : > { %v1908_v62 = vpop.f32.mrb[5].mxu0  ;;  %2169 = vtanh.f32 %v674_v58  ;;  %v1932_v3 = vpop.f32.mrb[5].mxu1 }
 0x10b   : > { %2171 = vtanh.f32 %v667_v60  ;;  %v1909_v1 = vadd.f32 %v1908_v62, %v1907_v61  ;;  %v1910_v2 = vpop.f32.mrb[6].mxu0  ;;  %v1933_v5 = vadd.f32 %v1932_v3, %v1931_v0  ;;  %v1934_v6 = vpop.f32.mrb[6].mxu1 }
 0x10c   : > { %v1911_v4 = vpop.f32.mrb[7].mxu0  ;;  %2173 = vtanh.f32 %v675_v63  ;;  %v1935_v9 = vpop.f32.mrb[7].mxu1 }
 0x10d   : > { %v612_v7 = vadd.f32 %v1909_v1, %v2660_v42  ;;  %v1912_v8 = vadd.f32 %v1911_v4, %v1910_v2  ;;  %v644_v10 = vadd.f32 %v1933_v5, %v2660_v42  ;;  %v1936_v11 = vadd.f32 %v1935_v9, %v1934_v6 }
 0x10f   : > { %v668_v12 = vmul.f32 0.5, %v612_v7  ;;  %v615_v13 = vadd.f32 %v1912_v8, %v2660_v42  ;;  %v676_v14 = vmul.f32 0.5, %v644_v10  ;;  %v647_v15 = vadd.f32 %v1936_v11, %v2660_v42 }
 0x111   : > { %2175 = vtanh.f32 %v668_v12  ;;  %v669_v16 = vmul.f32 0.5, %v615_v13  ;;  %v1913_v17 = vpop.f32.mrb[8].mxu0  ;;  %v677_v19 = vmul.f32 0.5, %v647_v15  ;;  %v1937_v20 = vpop.f32.mrb[8].mxu1 }
 0x112   : > { %v1914_v18 = vpop.f32.mrb[9].mxu0  ;;  %2177 = vtanh.f32 %v676_v14  ;;  %v1938_v24 = vpop.f32.mrb[9].mxu1 }
 0x113   : > { %v2168_v21 = vpop.eup %2167  ;;  %2179 = vtanh.f32 %v669_v16  ;;  %v1915_v22 = vadd.f32 %v1914_v18, %v1913_v17  ;;  %v1916_v23 = vpop.f32.mrb[10].mxu0  ;;  %v1939_v28 = vadd.f32 %v1938_v24, %v1937_v20 }
 0x114   : > { %v2170_v25 = vpop.eup %2169  ;;  %v698_v26 = vmul.f32 0.5, %v2168_v21  ;;  %v1917_v27 = vpop.f32.mrb[11].mxu0  ;;  %2181 = vtanh.f32 %v677_v19 }
 0x115   : > { %v1940_v29 = vpop.f32.mrb[10].mxu1  ;;  %v2172_v30 = vpop.eup %2171  ;;  %v620_v31 = vadd.f32 %v1915_v22, %v2660_v42  ;;  %v1918_v32 = vadd.f32 %v1917_v27, %v1916_v23  ;;  %v706_v33 = vmul.f32 0.5, %v2170_v25  ;;  %v652_v37 = vadd.f32 %v1939_v28, %v2660_v42 }
 0x116   : > { %v1941_v34 = vpop.f32.mrb[11].mxu1  ;;  %v2174_v35 = vpop.eup %2173  ;;  %v699_v36 = vmul.f32 0.5, %v2172_v30  ;;  %v714_v45 = vadd.f32 0.5, %v698_v26 }
 0x117   : > { %v1942_v38 = vadd.f32 %v1941_v34, %v1940_v29  ;;  %v670_v39 = vmul.f32 0.5, %v620_v31  ;;  %v623_v41 = vadd.f32 %v1918_v32, %v2660_v42  ;;  %v707_v43 = vmul.f32 0.5, %v2174_v35 }
 0x118   : > { %v2673_v44 = vadd.f32 0.5, %v706_v33  ;;  %v715_v46 = vadd.f32 0.5, %v699_v36  ;;  %v678_v47 = vmul.f32 0.5, %v652_v37 }
 0x119   : > { %v655_v48 = vadd.f32 %v1942_v38, %v2660_v42  ;;  %2183 = vtanh.f32 %v670_v39  ;;  %v671_v49 = vmul.f32 0.5, %v623_v41  ;;  %v1919_v50 = vpop.f32.mrb[12].mxu0  ;;  %v2676_v51 = vadd.f32 0.5, %v707_v43  ;;  %v1943_v55 = vpop.f32.mrb[12].mxu1 }
 0x11a   : > { %v1920_v52 = vpop.f32.mrb[13].mxu0  ;;  %v747_v53 = vpack.c.bf16 %v715_v46, %v714_v45  ;;  %2185 = vtanh.f32 %v678_v47  ;;  %v1944_v59 = vpop.f32.mrb[13].mxu1 }
 0x11b   : > { %v679_v54 = vmul.f32 0.5, %v655_v48  ;;  %v2176_v56 = vpop.eup %2175  ;;  %2187 = vtanh.f32 %v671_v49  ;;  %v1921_v57 = vadd.f32 %v1920_v52, %v1919_v50  ;;  %v1922_v58 = vpop.f32.mrb[14].mxu0  ;;  %v751_v60 = vpack.c.bf16 %v2676_v51, %v2673_v44  ;;  %v2142_v44 = vld [vmem:[%s2939_s5 + $0x18] sm:$0xff]   ;;  %v2143_v51 = vld [vmem:[%s2941_s7] ss:$8 sps:$4 sm:$0xff]  }
 0x11c   : > { %v2178_v61 = vpop.eup %2177  ;;  %v700_v62 = vmul.f32 0.5, %v2176_v56  ;;  %v1923_v63 = vpop.f32.mrb[15].mxu0  ;;  %1993 = vmatprep.mubr.bf16.mxu1 %v747_v53  ;;  %v1945_v0 = vadd.f32 %v1944_v59, %v1943_v55  ;;  %v2141_v55 = vld [vmem:[%s2939_s5 + $0x10] sm:$0xff]   ;;  %v2145_v56 = vld [vmem:[%s2941_s7 + $0x4] ss:$8 sps:$4 sm:$0xff]  }
 0x11d   : > { %2189 = vtanh.f32 %v679_v54  ;;  %v1946_v1 = vpop.f32.mrb[14].mxu1  ;;  %v2180_v2 = vpop.eup %2179  ;;  %v628_v3 = vadd.f32 %v1921_v57, %v2660_v42  ;;  %v1924_v4 = vadd.f32 %v1923_v63, %v1922_v58  ;;  %v708_v5 = vmul.f32 0.5, %v2178_v61  ;;  %v2140_v54 = vld [vmem:[%s2939_s5 + $0x8] sm:$0xff]   ;;  %v2148_v57 = vld [vmem:[%s2941_s7 + $0x14] ss:$8 sps:$4 sm:$0xff]   ;;  %1319 = vmatprep.subr.bf16.mxu0 %v2145_v56 }
 0x11e   : > { %v1947_v6 = vpop.f32.mrb[15].mxu1  ;;  %v2182_v7 = vpop.eup %2181  ;;  %v701_v8 = vmul.f32 0.5, %v2180_v2  ;;  %v660_v9 = vadd.f32 %v1945_v0, %v2660_v42  ;;  %v716_v15 = vadd.f32 0.5, %v700_v62  ;;  %1320 = vmatpush1.bf16.msra.mxu0 %v2143_v51  ;;  %v2146_v58 = vld [vmem:[%s2941_s7 + $0x10] ss:$8 sps:$4 sm:$0xff]  }
 0x11f   : > { %v1948_v10 = vadd.f32 %v1947_v6, %v1946_v1  ;;  %v672_v11 = vmul.f32 0.5, %v628_v3  ;;  %v631_v12 = vadd.f32 %v1924_v4, %v2660_v42  ;;  %v709_v13 = vmul.f32 0.5, %v2182_v7  ;;  %1321 = vmatprep.subr.bf16.mxu0 %v2148_v57  ;;  %v2712_v59 = vld [vmem:[%s2938_s4] ss:$0 sm:$0xff] }
 0x120   : > { %v724_v14 = vadd.f32 0.5, %v708_v5  ;;  %v717_v16 = vadd.f32 0.5, %v701_v8  ;;  %v680_v17 = vmul.f32 0.5, %v660_v9 }
 0x121   : > { %v663_v18 = vadd.f32 %v1948_v10, %v2660_v42  ;;  %2191 = vtanh.f32 %v672_v11  ;;  %v673_v19 = vmul.f32 0.5, %v631_v12  ;;  %v725_v20 = vadd.f32 0.5, %v709_v13 }
 0x122   : > { %v748_v21 = vpack.c.bf16 %v717_v16, %v716_v15  ;;  %2193 = vtanh.f32 %v680_v17  ;;  %1322 = vmatpush1.bf16.msra.mxu0 %v2146_v58 }
 0x123   : > { %v681_v22 = vmul.f32 0.5, %v663_v18  ;;  %v2184_v23 = vpop.eup %2183  ;;  %2195 = vtanh.f32 %v673_v19  ;;  %v752_v24 = vpack.c.bf16 %v725_v20, %v724_v14 }
 0x124   : > { %v2186_v25 = vpop.eup %2185  ;;  %v702_v26 = vmul.f32 0.5, %v2184_v23  ;;  %1994 = vmatmul.mubr.bf16.vlgmr.msra.gmra.mrb[16].mxu1 %v748_v21 }
 0x125   : > { %2197 = vtanh.f32 %v681_v22  ;;  %v2188_v27 = vpop.eup %2187  ;;  %v710_v28 = vmul.f32 0.5, %v2186_v25  ;;  %2010 = vmatpush3.bf16.msra.mxu1 %v2654_v40 }
 0x126   : > { %v703_v30 = vmul.f32 0.5, %v2188_v27  ;;  %v718_v32 = vadd.f32 0.5, %v702_v26  ;;  %2011 = vmatprep.subr.bf16.mxu1 %v2140_v54 }
 0x127   : > { %v2190_v29 = vpop.eup %2189  ;;  %v726_v31 = vadd.f32 0.5, %v710_v28 }
 0x128   : > { %v711_v42 = vmul.f32 0.5, %v2190_v29  ;;  %v719_v33 = vadd.f32 0.5, %v703_v30 }
 0x129   : > { %2012 = vmatpush3.bf16.msra.mxu1 %v2140_v54 }
 0x12a   : > { %v727_v34 = vadd.f32 0.5, %v711_v42  ;;  %v749_v35 = vpack.c.bf16 %v719_v33, %v718_v32  ;;  %2013 = vmatprep.subr.bf16.mxu1 %v2141_v55 }
 0x12b   : > { %v2192_v36 = vpop.eup %2191 }
 0x12c   : > { %v753_v37 = vpack.c.bf16 %v727_v34, %v726_v31  ;;  %v2194_v38 = vpop.eup %2193  ;;  %v704_v39 = vmul.f32 0.5, %v2192_v36  ;;  %1997 = vmatprep.mubr.bf16.mxu1 %v749_v35 }
 0x12d   : > { %v2196_v41 = vpop.eup %2195  ;;  %v712_v43 = vmul.f32 0.5, %v2194_v38  ;;  %2014 = vmatpush3.bf16.msra.mxu1 %v2141_v55 }
 0x12e   : > { %v705_v46 = vmul.f32 0.5, %v2196_v41  ;;  %v720_v40 = vadd.f32 0.5, %v704_v39  ;;  %2015 = vmatprep.subr.bf16.mxu1 %v2142_v44 }
 0x12f   : > { %v2198_v45 = vpop.eup %2197  ;;  %v728_v48 = vadd.f32 0.5, %v712_v43 }
 0x130   : > { %v713_v47 = vmul.f32 0.5, %v2198_v45  ;;  %v721_v49 = vadd.f32 0.5, %v705_v46 }
 0x131   : > { %2016 = vmatpush3.bf16.msra.mxu1 %v2142_v44 }
 0x132   : > { %v729_v50 = vadd.f32 0.5, %v713_v47  ;;  %v750_v52 = vpack.c.bf16 %v721_v49, %v720_v40 }
 0x134   : > { %v754_v53 = vpack.c.bf16 %v729_v50, %v728_v48  ;;  %1998 = vmatmul.mubr.bf16.gmra.mrb[20].mxu1 %v750_v52 }
 0x135   : > { %2001 = vmatprep.mubr.bf16.mxu1 %v751_v60 }
 0x13c   : > { %2002 = vmatmul.mubr.bf16.gmra.mrb[24].mxu1 %v752_v24 }
 0x13d   : > { %2005 = vmatprep.mubr.bf16.mxu1 %v753_v37 }
 0x144   : > { %2006 = vmatmul.mubr.bf16.gmra.mrb[28].mxu1 %v754_v53 }
 0x1f7   : > { %v1995_v60 = vpop.f32.mrb[16].mxu1 }
 0x1f8   : > { %v852_v61 = vadd.f32 %v1995_v60, %v2712_v59  ;;  %v843_v62 = vpop.f32.mrb[17].mxu1 }
 0x1f9   : > { %v844_v63 = vadd.f32 %v2712_v59, %v843_v62  ;;  %v1996_v0 = vpop.f32.mrb[18].mxu1 }
 0x1fa   : > { %v908_v1 = vmul.f32 0.5, %v852_v61  ;;  %v855_v2 = vadd.f32 %v1996_v0, %v2712_v59  ;;  %v846_v3 = vpop.f32.mrb[19].mxu1 }
 0x1fb   : > { %v906_v4 = vmul.f32 0.5, %v844_v63  ;;  %v847_v5 = vadd.f32 %v2712_v59, %v846_v3 }
 0x1fc   : > { %2199 = vtanh.f32 %v908_v1  ;;  %v909_v6 = vmul.f32 0.5, %v855_v2 }
 0x1fd   : > { %2201 = vtanh.f32 %v906_v4  ;;  %v907_v7 = vmul.f32 0.5, %v847_v5 }
 0x1fe   : > { %2203 = vtanh.f32 %v909_v6 }
 0x1ff   : > { %2205 = vtanh.f32 %v907_v7 }
 0x206   : > { %v2200_v8 = vpop.eup %2199 }
 0x207   : > { %v2202_v9 = vpop.eup %2201  ;;  %v940_v10 = vmul.f32 0.5, %v2200_v8  ;;  %v1999_v11 = vpop.f32.mrb[20].mxu1 }
 0x208   : > { %v2204_v12 = vpop.eup %2203  ;;  %v938_v13 = vmul.f32 0.5, %v2202_v9  ;;  %v868_v14 = vadd.f32 %v1999_v11, %v2712_v59  ;;  %v859_v15 = vpop.f32.mrb[21].mxu1 }
 0x209   : > { %v2206_v16 = vpop.eup %2205  ;;  %v941_v17 = vmul.f32 0.5, %v2204_v12  ;;  %v860_v18 = vadd.f32 %v2712_v59, %v859_v15  ;;  %v2000_v19 = vpop.f32.mrb[22].mxu1  ;;  %v956_v24 = vadd.f32 0.5, %v940_v10 }
 0x20a   : > { %v939_v20 = vmul.f32 0.5, %v2206_v16  ;;  %v912_v21 = vmul.f32 0.5, %v868_v14  ;;  %v871_v22 = vadd.f32 %v2000_v19, %v2712_v59  ;;  %v862_v23 = vpop.f32.mrb[23].mxu1  ;;  %v954_v28 = vadd.f32 0.5, %v938_v13 }
 0x20b   : > { %v957_v25 = vadd.f32 0.5, %v941_v17  ;;  %v910_v26 = vmul.f32 0.5, %v860_v18  ;;  %v863_v27 = vadd.f32 %v2712_v59, %v862_v23 }
 0x20c   : > { %v955_v29 = vadd.f32 0.5, %v939_v20  ;;  %2207 = vtanh.f32 %v912_v21  ;;  %v913_v30 = vmul.f32 0.5, %v871_v22 }
 0x20d   : > { %v980_v42 = vpack.c.bf16 %v957_v25, %v956_v24  ;;  %2209 = vtanh.f32 %v910_v26  ;;  %v911_v31 = vmul.f32 0.5, %v863_v27 }
 0x20e   : > { %v979_v32 = vpack.c.bf16 %v955_v29, %v954_v28  ;;  %2211 = vtanh.f32 %v913_v30 }
 0x20f   : > { %2213 = vtanh.f32 %v911_v31  ;;  %v2003_v33 = vpop.f32.mrb[24].mxu1 }
 0x210   : > { %v884_v34 = vadd.f32 %v2003_v33, %v2712_v59  ;;  %v875_v35 = vpop.f32.mrb[25].mxu1  ;;  %2017 = vmatprep.mubr.msk.bf16.mxu1 %vm1017_vm0, %v979_v32 }
 0x211   : > { %v876_v36 = vadd.f32 %v2712_v59, %v875_v35  ;;  %v2004_v37 = vpop.f32.mrb[26].mxu1  ;;  %2018 = vmatmul.mubr.msk.bf16.vlgmr.msra.gmra.mrb[32].mxu1 %vm1017_vm0, %v980_v42  ;;  %v2151_v35 = vld [vmem:[%s2941_s7 + $0x24] ss:$8 sps:$4 sm:$0xff]  }
 0x212   : > { %v916_v38 = vmul.f32 0.5, %v884_v34  ;;  %v887_v39 = vadd.f32 %v2004_v37, %v2712_v59  ;;  %v878_v41 = vpop.f32.mrb[27].mxu1  ;;  %1323 = vmatprep.subr.bf16.mxu0 %v2151_v35  ;;  %v2154_v37 = vld [vmem:[%s2941_s7 + $0x34] ss:$8 sps:$4 sm:$0xff]  }
 0x213   : > { %v914_v43 = vmul.f32 0.5, %v876_v36  ;;  %v879_v45 = vadd.f32 %v2712_v59, %v878_v41  ;;  %v2149_v36 = vld [vmem:[%s2941_s7 + $0x20] ss:$8 sps:$4 sm:$0xff]  }
 0x214   : > { %2215 = vtanh.f32 %v916_v38  ;;  %v917_v46 = vmul.f32 0.5, %v887_v39  ;;  %1324 = vmatpush1.bf16.msra.mxu0 %v2149_v36  ;;  %v2152_v38 = vld [vmem:[%s2941_s7 + $0x30] ss:$8 sps:$4 sm:$0xff]   ;;  %v2157_v39 = vld [vmem:[%s2941_s7 + $0x44] ss:$8 sps:$4 sm:$0xff]  }
 0x215   : > { %2217 = vtanh.f32 %v914_v43  ;;  %v915_v47 = vmul.f32 0.5, %v879_v45  ;;  %1325 = vmatprep.subr.bf16.mxu0 %v2154_v37  ;;  %v2155_v41 = vld [vmem:[%s2941_s7 + $0x40] ss:$8 sps:$4 sm:$0xff]   ;;  %v2160_v43 = vld [vmem:[%s2941_s7 + $0x54] ss:$8 sps:$4 sm:$0xff]  }
 0x216   : > { %v2208_v48 = vpop.eup %2207  ;;  %2219 = vtanh.f32 %v917_v46  ;;  %v2158_v45 = vld [vmem:[%s2941_s7 + $0x50] ss:$8 sps:$4 sm:$0xff]   ;;  %v2163_v46 = vld [vmem:[%s2941_s7 + $0x64] ss:$8 sps:$4 sm:$0xff]  }
 0x217   : > { %v2210_v40 = vpop.eup %2209  ;;  %v944_v49 = vmul.f32 0.5, %v2208_v48  ;;  %2221 = vtanh.f32 %v915_v47  ;;  %v2007_v50 = vpop.f32.mrb[28].mxu1  ;;  %v2161_v47 = vld [vmem:[%s2941_s7 + $0x60] ss:$8 sps:$4 sm:$0xff]   ;;  %v2166_v48 = vld [vmem:[%s2941_s7 + $0x74] ss:$8 sps:$4 sm:$0xff]  }
 0x218   : > { %v2212_v52 = vpop.eup %2211  ;;  %v942_v53 = vmul.f32 0.5, %v2210_v40  ;;  %v900_v54 = vadd.f32 %v2007_v50, %v2712_v59  ;;  %v891_v55 = vpop.f32.mrb[29].mxu1  ;;  %1326 = vmatpush1.bf16.msra.mxu0 %v2152_v38  ;;  %v2164_v40 = vld [vmem:[%s2941_s7 + $0x70] ss:$8 sps:$4 sm:$0xff]   ;;  %v2778_v50 = vld [vmem:[%s2940_s6] ss:$0 sm:$0xff] }
 0x219   : > { %v2214_v44 = vpop.eup %2213  ;;  %v945_v51 = vmul.f32 0.5, %v2212_v52  ;;  %v892_v56 = vadd.f32 %v2712_v59, %v891_v55  ;;  %v2008_v57 = vpop.f32.mrb[30].mxu1  ;;  %v960_v63 = vadd.f32 0.5, %v944_v49  ;;  %1327 = vmatprep.subr.bf16.mxu0 %v2157_v39  ;;  %v2455_v49 = vmov 0  }
 0x21a   : > { %v943_v58 = vmul.f32 0.5, %v2214_v44  ;;  %v920_v60 = vmul.f32 0.5, %v900_v54  ;;  %v903_v61 = vadd.f32 %v2008_v57, %v2712_v59  ;;  %v894_v62 = vpop.f32.mrb[31].mxu1  ;;  %v958_v3 = vadd.f32 0.5, %v942_v53  ;;  %1351 = vmatprep.mubr.bf16.mxu0 %v2455_v49 }
 0x21b   : > { %v961_v0 = vadd.f32 0.5, %v945_v51  ;;  %v918_v1 = vmul.f32 0.5, %v892_v56  ;;  %v895_v2 = vadd.f32 %v2712_v59, %v894_v62 }
 0x21c   : > { %v959_v4 = vadd.f32 0.5, %v943_v58  ;;  %2223 = vtanh.f32 %v920_v60  ;;  %v921_v5 = vmul.f32 0.5, %v903_v61  ;;  %1328 = vmatpush1.bf16.msra.mxu0 %v2155_v41 }
 0x21d   : > { %v982_v6 = vpack.c.bf16 %v961_v0, %v960_v63  ;;  %2225 = vtanh.f32 %v918_v1  ;;  %v919_v7 = vmul.f32 0.5, %v895_v2  ;;  %1329 = vmatprep.subr.bf16.mxu0 %v2160_v43 }
 0x21e   : > { %v2216_v8 = vpop.eup %2215  ;;  %v981_v9 = vpack.c.bf16 %v959_v4, %v958_v3  ;;  %2227 = vtanh.f32 %v921_v5 }
 0x21f   : > { %v2218_v10 = vpop.eup %2217  ;;  %v948_v11 = vmul.f32 0.5, %v2216_v8  ;;  %2229 = vtanh.f32 %v919_v7 }
 0x220   : > { %v2220_v12 = vpop.eup %2219  ;;  %v946_v13 = vmul.f32 0.5, %v2218_v10  ;;  %2021 = vmatprep.mubr.msk.bf16.mxu1 %vm1017_vm0, %v981_v9  ;;  %1330 = vmatpush1.bf16.msra.mxu0 %v2158_v45 }
 0x221   : > { %v2222_v14 = vpop.eup %2221  ;;  %v964_v15 = vadd.f32 0.5, %v948_v11  ;;  %v949_v59 = vmul.f32 0.5, %v2220_v12  ;;  %2022 = vmatmul.mubr.msk.bf16.gmra.mrb[36].mxu1 %vm1017_vm0, %v982_v6  ;;  %1331 = vmatprep.subr.bf16.mxu0 %v2163_v46 }
 0x222   : > { %v962_v16 = vadd.f32 0.5, %v946_v13  ;;  %v947_v17 = vmul.f32 0.5, %v2222_v14 }
 0x223   : > { %v965_v18 = vadd.f32 0.5, %v949_v59 }
 0x224   : > { %v963_v19 = vadd.f32 0.5, %v947_v17  ;;  %1332 = vmatpush1.bf16.msra.mxu0 %v2161_v47 }
 0x225   : > { %v984_v20 = vpack.c.bf16 %v965_v18, %v964_v15  ;;  %1333 = vmatprep.subr.bf16.mxu0 %v2166_v48 }
 0x226   : > { %v2224_v21 = vpop.eup %2223  ;;  %v983_v22 = vpack.c.bf16 %v963_v19, %v962_v16 }
 0x227   : > { %v2226_v23 = vpop.eup %2225  ;;  %v952_v24 = vmul.f32 0.5, %v2224_v21 }
 0x228   : > { %v2228_v25 = vpop.eup %2227  ;;  %v950_v26 = vmul.f32 0.5, %v2226_v23  ;;  %2025 = vmatprep.mubr.msk.bf16.mxu1 %vm1017_vm0, %v983_v22  ;;  %1334 = vmatpush1.bf16.msra.mxu0 %v2164_v40 }
 0x229   : > { %v2230_v27 = vpop.eup %2229  ;;  %v968_v28 = vadd.f32 0.5, %v952_v24  ;;  %v953_v29 = vmul.f32 0.5, %v2228_v25  ;;  %2026 = vmatmul.mubr.msk.bf16.gmra.mrb[40].mxu1 %vm1017_vm0, %v984_v20 }
 0x22a   : > { %v966_v30 = vadd.f32 0.5, %v950_v26  ;;  %v951_v42 = vmul.f32 0.5, %v2230_v27 }
 0x22b   : > { %v969_v31 = vadd.f32 0.5, %v953_v29 }
 0x22c   : > { %v967_v32 = vadd.f32 0.5, %v951_v42 }
 0x22d   : > { %v986_v33 = vpack.c.bf16 %v969_v31, %v968_v28 }
 0x22e   : > { %v985_v34 = vpack.c.bf16 %v967_v32, %v966_v30 }
 0x230   : > { %2029 = vmatprep.mubr.msk.bf16.mxu1 %vm1017_vm0, %v985_v34 }
 0x231   : > { %2030 = vmatmul.mubr.msk.bf16.gmra.mrb[44].mxu1 %vm1017_vm0, %v986_v33 }
 0x2e4   : > { %v2019_v52 = vpop.f32.mrb[32].mxu1 }
 0x2e5   : > { %v1085_v53 = vadd.f32 %v2019_v52, %v2778_v50  ;;  %v1076_v54 = vpop.f32.mrb[33].mxu1 }
 0x2e6   : > { %v1077_v55 = vadd.f32 %v2778_v50, %v1076_v54  ;;  %v2020_v44 = vpop.f32.mrb[34].mxu1 }
 0x2e7   : > { %v1141_v51 = vmul.f32 0.5, %v1085_v53  ;;  %v1088_v56 = vadd.f32 %v2020_v44, %v2778_v50  ;;  %v1079_v57 = vpop.f32.mrb[35].mxu1 }
 0x2e8   : > { %v1139_v58 = vmul.f32 0.5, %v1077_v55  ;;  %v1080_v60 = vadd.f32 %v2778_v50, %v1079_v57 }
 0x2e9   : > { %2231 = vtanh.f32 %v1141_v51  ;;  %v1142_v61 = vmul.f32 0.5, %v1088_v56 }
 0x2ea   : > { %2233 = vtanh.f32 %v1139_v58  ;;  %v1140_v62 = vmul.f32 0.5, %v1080_v60 }
 0x2eb   : > { %2235 = vtanh.f32 %v1142_v61 }
 0x2ec   : > { %2237 = vtanh.f32 %v1140_v62 }
 0x2f3   : > { %v2232_v63 = vpop.eup %2231 }
 0x2f4   : > { %v2234_v0 = vpop.eup %2233  ;;  %v1173_v1 = vmul.f32 0.5, %v2232_v63  ;;  %v2023_v2 = vpop.f32.mrb[36].mxu1 }
 0x2f5   : > { %v2236_v3 = vpop.eup %2235  ;;  %v1171_v4 = vmul.f32 0.5, %v2234_v0  ;;  %v1101_v5 = vadd.f32 %v2023_v2, %v2778_v50  ;;  %v1092_v6 = vpop.f32.mrb[37].mxu1 }
 0x2f6   : > { %v2238_v7 = vpop.eup %2237  ;;  %v1174_v8 = vmul.f32 0.5, %v2236_v3  ;;  %v1093_v9 = vadd.f32 %v2778_v50, %v1092_v6  ;;  %v2024_v10 = vpop.f32.mrb[38].mxu1  ;;  %v1189_v15 = vadd.f32 0.5, %v1173_v1 }
 0x2f7   : > { %v1172_v11 = vmul.f32 0.5, %v2238_v7  ;;  %v1145_v12 = vmul.f32 0.5, %v1101_v5  ;;  %v1104_v13 = vadd.f32 %v2024_v10, %v2778_v50  ;;  %v1095_v14 = vpop.f32.mrb[39].mxu1  ;;  %v1187_v18 = vadd.f32 0.5, %v1171_v4 }
 0x2f8   : > { %v1190_v59 = vadd.f32 0.5, %v1174_v8  ;;  %v1143_v16 = vmul.f32 0.5, %v1093_v9  ;;  %v1096_v17 = vadd.f32 %v2778_v50, %v1095_v14 }
 0x2f9   : > { %v1188_v19 = vadd.f32 0.5, %v1172_v11  ;;  %2239 = vtanh.f32 %v1145_v12  ;;  %v1146_v20 = vmul.f32 0.5, %v1104_v13 }
 0x2fa   : > { %2241 = vtanh.f32 %v1143_v16  ;;  %v1144_v21 = vmul.f32 0.5, %v1096_v17  ;;  %v1221_v22 = vpack.c.bf16 %v1190_v59, %v1189_v15 }
 0x2fb   : > { %v1220_v23 = vpack.c.bf16 %v1188_v19, %v1187_v18  ;;  %2243 = vtanh.f32 %v1146_v20 }
 0x2fc   : > { %2245 = vtanh.f32 %v1144_v21  ;;  %v2027_v24 = vpop.f32.mrb[40].mxu1 }
 0x2fd   : > { %v1117_v25 = vadd.f32 %v2027_v24, %v2778_v50  ;;  %v1108_v26 = vpop.f32.mrb[41].mxu1  ;;  %1352 = vmatmul.mubr.bf16.vlgmr.msra.gmra.mrb[16].mxu0 %v1220_v23 }
 0x2fe   : > { %v1109_v27 = vadd.f32 %v2778_v50, %v1108_v26  ;;  %v2028_v28 = vpop.f32.mrb[42].mxu1  ;;  %1361 = vmatprep.mubr.bf16.mxu0 %v2455_v49 }
 0x2ff   : > { %v1149_v29 = vmul.f32 0.5, %v1117_v25  ;;  %v1120_v30 = vadd.f32 %v2028_v28, %v2778_v50  ;;  %v1111_v42 = vpop.f32.mrb[43].mxu1 }
 0x300   : > { %v1147_v31 = vmul.f32 0.5, %v1109_v27  ;;  %v1112_v32 = vadd.f32 %v2778_v50, %v1111_v42  ;;  %v1229_v27 = vlaneseq }
 0x301   : > { %2247 = vtanh.f32 %v1149_v29  ;;  %v1150_v33 = vmul.f32 0.5, %v1120_v30  ;;  %v1219_v30 = vld [vmem:[%s2942_s8] sm:$0x3] }
 0x302   : > { %2249 = vtanh.f32 %v1147_v31  ;;  %v1148_v34 = vmul.f32 0.5, %v1112_v32  ;;  %v1230_v28 = vshrl.u32 %v1229_v27, 7 }
 0x303   : > { %v2240_v35 = vpop.eup %2239  ;;  %2251 = vtanh.f32 %v1150_v33 }
 0x304   : > { %v2242_v36 = vpop.eup %2241  ;;  %v1177_v37 = vmul.f32 0.5, %v2240_v35  ;;  %2253 = vtanh.f32 %v1148_v34  ;;  %v2031_v38 = vpop.f32.mrb[44].mxu1  ;;  %v1231_v29 = vsub.s32 0, %v1230_v28  ;;  %v1235_v42 = vsub.s32 1, %v1230_v28 }
 0x305   : > { %v2244_v39 = vpop.eup %2243  ;;  %v1175_v41 = vmul.f32 0.5, %v2242_v36  ;;  %1362 = vmatmul.mubr.bf16.gmra.mrb[20].mxu0 %v1221_v22  ;;  %v1133_v43 = vadd.f32 %v2031_v38, %v2778_v50  ;;  %v1124_v45 = vpop.f32.mrb[45].mxu1 }
 0x306   : > { %v2246_v46 = vpop.eup %2245  ;;  %v1178_v47 = vmul.f32 0.5, %v2244_v39  ;;  %v1125_v48 = vadd.f32 %v2778_v50, %v1124_v45  ;;  %v2032_v40 = vpop.f32.mrb[46].mxu1  ;;  %1371 = vmatprep.mubr.bf16.mxu0 %v2455_v49  ;;  %v1193_v44 = vadd.f32 0.5, %v1177_v37  ;;  %v2806_v31 = vrot.slane %v1219_v30, %v1231_v29 }
 0x307   : > { %v1176_v52 = vmul.f32 0.5, %v2246_v46  ;;  %v1153_v53 = vmul.f32 0.5, %v1133_v43  ;;  %v1136_v54 = vadd.f32 %v2032_v40, %v2778_v50  ;;  %v1127_v55 = vpop.f32.mrb[47].mxu1  ;;  %v1191_v58 = vadd.f32 0.5, %v1175_v41 }
 0x308   : > { %v1194_v51 = vadd.f32 0.5, %v1178_v47  ;;  %v1151_v56 = vmul.f32 0.5, %v1125_v48  ;;  %v1128_v57 = vadd.f32 %v2778_v50, %v1127_v55  ;;  %v2808_v32 = vrot.slane %v1219_v30, %v1235_v42 }
 0x309   : > { %v1192_v60 = vadd.f32 0.5, %v1176_v52  ;;  %2255 = vtanh.f32 %v1153_v53  ;;  %v1154_v61 = vmul.f32 0.5, %v1136_v54 }
 0x30a   : > { %2257 = vtanh.f32 %v1151_v56  ;;  %v1152_v62 = vmul.f32 0.5, %v1128_v57  ;;  %v1223_v63 = vpack.c.bf16 %v1194_v51, %v1193_v44 }
 0x30b   : > { %v2248_v0 = vpop.eup %2247  ;;  %2259 = vtanh.f32 %v1154_v61  ;;  %v1222_v1 = vpack.c.bf16 %v1192_v60, %v1191_v58 }
 0x30c   : > { %v2250_v2 = vpop.eup %2249  ;;  %v1181_v3 = vmul.f32 0.5, %v2248_v0  ;;  %2261 = vtanh.f32 %v1152_v62 }
 0x30d   : > { %v2252_v4 = vpop.eup %2251  ;;  %v1179_v5 = vmul.f32 0.5, %v2250_v2  ;;  %1372 = vmatmul.mubr.bf16.gmra.mrb[24].mxu0 %v1222_v1 }
 0x30e   : > { %v2254_v6 = vpop.eup %2253  ;;  %v1197_v7 = vadd.f32 0.5, %v1181_v3  ;;  %v1182_v8 = vmul.f32 0.5, %v2252_v4  ;;  %1381 = vmatprep.mubr.bf16.mxu0 %v2455_v49 }
 0x30f   : > { %v1180_v50 = vmul.f32 0.5, %v2254_v6  ;;  %v1195_v10 = vadd.f32 0.5, %v1179_v5 }
 0x310   : > { %v1198_v9 = vadd.f32 0.5, %v1182_v8 }
 0x311   : > { %v1196_v11 = vadd.f32 0.5, %v1180_v50 }
 0x312   : > { %v1225_v12 = vpack.c.bf16 %v1198_v9, %v1197_v7 }
 0x313   : > { %v2256_v13 = vpop.eup %2255  ;;  %v1224_v14 = vpack.c.bf16 %v1196_v11, %v1195_v10 }
 0x314   : > { %v2258_v15 = vpop.eup %2257  ;;  %v1185_v59 = vmul.f32 0.5, %v2256_v13 }
 0x315   : > { %v2260_v16 = vpop.eup %2259  ;;  %v1183_v17 = vmul.f32 0.5, %v2258_v15  ;;  %1382 = vmatmul.mubr.bf16.gmra.mrb[28].mxu0 %v1223_v63 }
 0x316   : > { %v2262_v18 = vpop.eup %2261  ;;  %v1201_v19 = vadd.f32 0.5, %v1185_v59  ;;  %v1186_v20 = vmul.f32 0.5, %v2260_v16  ;;  %1391 = vmatprep.mubr.bf16.mxu0 %v2455_v49 }
 0x317   : > { %v1199_v21 = vadd.f32 0.5, %v1183_v17  ;;  %v1184_v22 = vmul.f32 0.5, %v2262_v18 }
 0x318   : > { %v1202_v23 = vadd.f32 0.5, %v1186_v20 }
 0x319   : > { %v1200_v24 = vadd.f32 0.5, %v1184_v22 }
 0x31a   : > { %v1227_v25 = vpack.c.bf16 %v1202_v23, %v1201_v19 }
 0x31b   : > { %v1226_v26 = vpack.c.bf16 %v1200_v24, %v1199_v21 }
 0x31d   : > { %1392 = vmatmul.mubr.bf16.gmra.mrb[32].mxu0 %v1224_v14 }
 0x31e   : > { %1401 = vmatprep.mubr.bf16.mxu0 %v2455_v49 }
 0x325   : > { %1402 = vmatmul.mubr.bf16.gmra.mrb[36].mxu0 %v1225_v12 }
 0x326   : > { %1411 = vmatprep.mubr.bf16.mxu0 %v2455_v49 }
 0x32d   : > { %1412 = vmatmul.mubr.bf16.gmra.mrb[40].mxu0 %v1226_v26 }
 0x32e   : > { %1421 = vmatprep.mubr.bf16.mxu0 %v2455_v49 }
 0x335   : > { %1422 = vmatmul.mubr.bf16.gmra.mrb[44].mxu0 %v1227_v25 }
 0x3d0   : > { %v1353_v33 = vpop.f32.mrb[16].mxu0 }
 0x3d1   : > { %v1354_v34 = vadd.f32 %v1353_v33, %v2806_v31  ;;  %v1355_v35 = vpop.f32.mrb[17].mxu0 }
 0x3d2   : > { %v1356_v36 = vadd.f32 %v1355_v35, %v2808_v32  ;;  %v1357_v49 = vpop.f32.mrb[18].mxu0 }
 0x3d3   : > { %v1432_v37 = vmul.f32 0.5, %v1354_v34  ;;  %v1358_v38 = vadd.f32 %v1357_v49, %v2806_v31  ;;  %v1359_v39 = vpop.f32.mrb[19].mxu0 }
 0x3d4   : > { %v1433_v41 = vmul.f32 0.5, %v1356_v36  ;;  %v1360_v43 = vadd.f32 %v1359_v39, %v2808_v32 }
 0x3d5   : > { %2263 = vtanh.f32 %v1432_v37  ;;  %v1434_v45 = vmul.f32 0.5, %v1358_v38 }
 0x3d6   : > { %2265 = vtanh.f32 %v1433_v41  ;;  %v1435_v46 = vmul.f32 0.5, %v1360_v43 }
 0x3d7   : > { %2267 = vtanh.f32 %v1434_v45 }
 0x3d8   : > { %2269 = vtanh.f32 %v1435_v46  ;;  %v1363_v47 = vpop.f32.mrb[20].mxu0 }
 0x3d9   : > { %v1364_v48 = vadd.f32 %v1363_v47, %v2806_v31  ;;  %v1365_v40 = vpop.f32.mrb[21].mxu0 }
 0x3da   : > { %v1366_v52 = vadd.f32 %v1365_v40, %v2808_v32  ;;  %v1367_v53 = vpop.f32.mrb[22].mxu0 }
 0x3db   : > { %v1436_v54 = vmul.f32 0.5, %v1364_v48  ;;  %v1368_v55 = vadd.f32 %v1367_v53, %v2806_v31  ;;  %v1369_v44 = vpop.f32.mrb[23].mxu0 }
 0x3dc   : > { %v1437_v51 = vmul.f32 0.5, %v1366_v52  ;;  %v1370_v56 = vadd.f32 %v1369_v44, %v2808_v32 }
 0x3dd   : > { %2271 = vtanh.f32 %v1436_v54  ;;  %v1438_v57 = vmul.f32 0.5, %v1368_v55 }
 0x3de   : > { %2273 = vtanh.f32 %v1437_v51  ;;  %v1439_v58 = vmul.f32 0.5, %v1370_v56 }
 0x3df   : > { %v2264_v60 = vpop.eup %2263  ;;  %2275 = vtanh.f32 %v1438_v57 }
 0x3e0   : > { %v2266_v61 = vpop.eup %2265  ;;  %v1496_v62 = vmul.f32 0.5, %v2264_v60  ;;  %2277 = vtanh.f32 %v1439_v58  ;;  %v1373_v63 = vpop.f32.mrb[24].mxu0 }
 0x3e1   : > { %v2268_v0 = vpop.eup %2267  ;;  %v1497_v1 = vmul.f32 0.5, %v2266_v61  ;;  %v1374_v2 = vadd.f32 %v1373_v63, %v2806_v31  ;;  %v1375_v3 = vpop.f32.mrb[25].mxu0 }
 0x3e2   : > { %v2270_v4 = vpop.eup %2269  ;;  %v1528_v5 = vadd.f32 0.5, %v1496_v62  ;;  %v1498_v6 = vmul.f32 0.5, %v2268_v0  ;;  %v1376_v7 = vadd.f32 %v1375_v3, %v2808_v32  ;;  %v1377_v8 = vpop.f32.mrb[26].mxu0 }
 0x3e3   : > { %v1529_v50 = vadd.f32 0.5, %v1497_v1  ;;  %v1499_v9 = vmul.f32 0.5, %v2270_v4  ;;  %v1440_v10 = vmul.f32 0.5, %v1374_v2  ;;  %v1378_v11 = vadd.f32 %v1377_v8, %v2806_v31  ;;  %v1379_v12 = vpop.f32.mrb[27].mxu0 }
 0x3e4   : > { %v1560_v13 = vmul.f32 0.5, %v1528_v5  ;;  %v1530_v14 = vadd.f32 0.5, %v1498_v6  ;;  %v1380_v15 = vadd.f32 %v1379_v12, %v2808_v32  ;;  %v1441_v18 = vmul.f32 0.5, %v1376_v7 }
 0x3e5   : > { %v1561_v59 = vmul.f32 0.5, %v1529_v50  ;;  %v1531_v16 = vadd.f32 0.5, %v1499_v9  ;;  %2279 = vtanh.f32 %v1440_v10  ;;  %v1442_v21 = vmul.f32 0.5, %v1378_v11 }
 0x3e6   : > { %2281 = vtanh.f32 %v1560_v13  ;;  %v1562_v17 = vmul.f32 0.5, %v1530_v14  ;;  %v1443_v24 = vmul.f32 0.5, %v1380_v15 }
 0x3e7   : > { %v2272_v19 = vpop.eup %2271  ;;  %2283 = vtanh.f32 %v1561_v59  ;;  %v1563_v20 = vmul.f32 0.5, %v1531_v16 }
 0x3e8   : > { %v2274_v22 = vpop.eup %2273  ;;  %2285 = vtanh.f32 %v1562_v17  ;;  %v1500_v23 = vmul.f32 0.5, %v2272_v19  ;;  %v1383_v25 = vpop.f32.mrb[28].mxu0 }
 0x3e9   : > { %v2276_v26 = vpop.eup %2275  ;;  %2287 = vtanh.f32 %v1563_v20  ;;  %v1501_v27 = vmul.f32 0.5, %v2274_v22  ;;  %v1384_v28 = vadd.f32 %v1383_v25, %v2806_v31  ;;  %v1385_v29 = vpop.f32.mrb[29].mxu0 }
 0x3ea   : > { %v2278_v30 = vpop.eup %2277  ;;  %v1532_v42 = vadd.f32 0.5, %v1500_v23  ;;  %v1502_v33 = vmul.f32 0.5, %v2276_v26  ;;  %2289 = vtanh.f32 %v1441_v18  ;;  %v1386_v34 = vadd.f32 %v1385_v29, %v2808_v32  ;;  %v1387_v35 = vpop.f32.mrb[30].mxu0 }
 0x3eb   : > { %v1533_v36 = vadd.f32 0.5, %v1501_v27  ;;  %v1503_v49 = vmul.f32 0.5, %v2278_v30  ;;  %2291 = vtanh.f32 %v1442_v21  ;;  %v1444_v37 = vmul.f32 0.5, %v1384_v28  ;;  %v1389_v38 = vpop.f32.mrb[31].mxu0 }
 0x3ec   : > { %v1564_v39 = vmul.f32 0.5, %v1532_v42  ;;  %v1534_v41 = vadd.f32 0.5, %v1502_v33  ;;  %2293 = vtanh.f32 %v1443_v24  ;;  %v1388_v46 = vadd.f32 %v1387_v35, %v2806_v31 }
 0x3ed   : > { %v1565_v43 = vmul.f32 0.5, %v1533_v36  ;;  %v1535_v45 = vadd.f32 0.5, %v1503_v49  ;;  %2295 = vtanh.f32 %v1444_v37  ;;  %v1445_v48 = vmul.f32 0.5, %v1386_v34 }
 0x3ee   : > { %2297 = vtanh.f32 %v1564_v39  ;;  %v1566_v47 = vmul.f32 0.5, %v1534_v41  ;;  %v1390_v40 = vadd.f32 %v1389_v38, %v2808_v32  ;;  %v1446_v54 = vmul.f32 0.5, %v1388_v46 }
 0x3ef   : > { %v2280_v52 = vpop.eup %2279  ;;  %2299 = vtanh.f32 %v1565_v43  ;;  %v1567_v53 = vmul.f32 0.5, %v1535_v45 }
 0x3f0   : > { %v2282_v55 = vpop.eup %2281  ;;  %2301 = vtanh.f32 %v1566_v47  ;;  %v1504_v44 = vmul.f32 0.5, %v2280_v52  ;;  %v1447_v51 = vmul.f32 0.5, %v1390_v40  ;;  %v1393_v56 = vpop.f32.mrb[32].mxu0 }
 0x3f1   : > { %v2284_v57 = vpop.eup %2283  ;;  %v1624_v58 = vmul.f32 0.5, %v2282_v55  ;;  %2303 = vtanh.f32 %v1567_v53  ;;  %v1394_v60 = vadd.f32 %v1393_v56, %v2806_v31  ;;  %v1395_v61 = vpop.f32.mrb[33].mxu0 }
 0x3f2   : > { %v2286_v62 = vpop.eup %2285  ;;  %v1625_v63 = vmul.f32 0.5, %v2284_v57  ;;  %v1536_v0 = vadd.f32 0.5, %v1504_v44  ;;  %2305 = vtanh.f32 %v1445_v48  ;;  %v1396_v1 = vadd.f32 %v1395_v61, %v2808_v32  ;;  %v1397_v2 = vpop.f32.mrb[34].mxu0 }
 0x3f3   : > { %v2288_v3 = vpop.eup %2287  ;;  %v1656_v4 = vadd.f32 0.5, %v1624_v58  ;;  %v1626_v5 = vmul.f32 0.5, %v2286_v62  ;;  %2307 = vtanh.f32 %v1446_v54  ;;  %v1448_v6 = vmul.f32 0.5, %v1394_v60  ;;  %v1399_v7 = vpop.f32.mrb[35].mxu0 }
 0x3f4   : > { %v2290_v8 = vpop.eup %2289  ;;  %v1657_v50 = vadd.f32 0.5, %v1625_v63  ;;  %v1627_v9 = vmul.f32 0.5, %v2288_v3  ;;  %v1568_v10 = vmul.f32 0.5, %v1536_v0  ;;  %2309 = vtanh.f32 %v1447_v51 }
 0x3f5   : > { %v2292_v11 = vpop.eup %2291  ;;  %1688 = vst [vmem:[%s2834_s17] sm:$0xff] %v1656_v4  ;;  %v1658_v12 = vadd.f32 0.5, %v1626_v5  ;;  %v1505_v13 = vmul.f32 0.5, %v2290_v8  ;;  %2311 = vtanh.f32 %v1448_v6  ;;  %v1449_v14 = vmul.f32 0.5, %v1396_v1 }
 0x3f6   : > { %v2294_v15 = vpop.eup %2293  ;;  %1689 = vst [vmem:[%s2834_s17 + $0x8] sm:$0xff] %v1657_v50  ;;  %v1659_v59 = vadd.f32 0.5, %v1627_v9  ;;  %2313 = vtanh.f32 %v1568_v10  ;;  %v1506_v16 = vmul.f32 0.5, %v2292_v11  ;;  %v1398_v17 = vadd.f32 %v1397_v2, %v2806_v31 }
 0x3f7   : > { %v2296_v18 = vpop.eup %2295  ;;  %1690 = vst [vmem:[%s2834_s17 + $0x10] sm:$0xff] %v1658_v12  ;;  %v1537_v19 = vadd.f32 0.5, %v1505_v13  ;;  %v1507_v20 = vmul.f32 0.5, %v2294_v15  ;;  %2315 = vtanh.f32 %v1449_v14  ;;  %v1400_v21 = vadd.f32 %v1399_v7, %v2808_v32 }
 0x3f8   : > { %v2298_v22 = vpop.eup %2297  ;;  %1691 = vst [vmem:[%s2834_s17 + $0x18] sm:$0xff] %v1659_v59  ;;  %v1538_v23 = vadd.f32 0.5, %v1506_v16  ;;  %v1508_v24 = vmul.f32 0.5, %v2296_v18  ;;  %v1450_v25 = vmul.f32 0.5, %v1398_v17  ;;  %v1403_v26 = vpop.f32.mrb[36].mxu0 }
 0x3f9   : > { %v2300_v27 = vpop.eup %2299  ;;  %v1628_v28 = vmul.f32 0.5, %v2298_v22  ;;  %v1569_v29 = vmul.f32 0.5, %v1537_v19  ;;  %v1539_v30 = vadd.f32 0.5, %v1507_v20  ;;  %v1451_v42 = vmul.f32 0.5, %v1400_v21  ;;  %v1405_v33 = vpop.f32.mrb[37].mxu0 }
 0x3fa   : > { %v2302_v34 = vpop.eup %2301  ;;  %v1629_v35 = vmul.f32 0.5, %v2300_v27  ;;  %v1570_v36 = vmul.f32 0.5, %v1538_v23  ;;  %v1540_v49 = vadd.f32 0.5, %v1508_v24  ;;  %2317 = vtanh.f32 %v1450_v25  ;;  %v1407_v37 = vpop.f32.mrb[38].mxu0 }
 0x3fb   : > { %v2304_v38 = vpop.eup %2303  ;;  %v1660_v39 = vadd.f32 0.5, %v1628_v28  ;;  %v1630_v41 = vmul.f32 0.5, %v2302_v34  ;;  %2319 = vtanh.f32 %v1569_v29  ;;  %v1571_v43 = vmul.f32 0.5, %v1539_v30  ;;  %v1409_v45 = vpop.f32.mrb[39].mxu0 }
 0x3fc   : > { %v2306_v46 = vpop.eup %2305  ;;  %v1661_v47 = vadd.f32 0.5, %v1629_v35  ;;  %v1631_v48 = vmul.f32 0.5, %v2304_v38  ;;  %2321 = vtanh.f32 %v1570_v36  ;;  %v1572_v40 = vmul.f32 0.5, %v1540_v49 }
 0x3fd   : > { %v2308_v52 = vpop.eup %2307  ;;  %1692 = vst [vmem:[%s2834_s17 + $0x20] sm:$0xff] %v1660_v39  ;;  %v1662_v53 = vadd.f32 0.5, %v1630_v41  ;;  %2323 = vtanh.f32 %v1571_v43  ;;  %v1509_v54 = vmul.f32 0.5, %v2306_v46  ;;  %v1404_v55 = vadd.f32 %v1403_v26, %v2806_v31 }
 0x3fe   : > { %v2310_v44 = vpop.eup %2309  ;;  %1693 = vst [vmem:[%s2834_s17 + $0x28] sm:$0xff] %v1661_v47  ;;  %v1663_v51 = vadd.f32 0.5, %v1631_v48  ;;  %2325 = vtanh.f32 %v1572_v40  ;;  %v1510_v56 = vmul.f32 0.5, %v2308_v52  ;;  %v1406_v57 = vadd.f32 %v1405_v33, %v2808_v32 }
 0x3ff   : > { %v2312_v58 = vpop.eup %2311  ;;  %1694 = vst [vmem:[%s2834_s17 + $0x30] sm:$0xff] %v1662_v53  ;;  %v1541_v60 = vadd.f32 0.5, %v1509_v54  ;;  %v1511_v61 = vmul.f32 0.5, %v2310_v44  ;;  %2327 = vtanh.f32 %v1451_v42  ;;  %v1452_v62 = vmul.f32 0.5, %v1404_v55 }
 0x400   : > { %v2314_v63 = vpop.eup %2313  ;;  %1695 = vst [vmem:[%s2834_s17 + $0x38] sm:$0xff] %v1663_v51  ;;  %v1542_v0 = vadd.f32 0.5, %v1510_v56  ;;  %v1512_v1 = vmul.f32 0.5, %v2312_v58  ;;  %v1453_v2 = vmul.f32 0.5, %v1406_v57  ;;  %v1408_v3 = vadd.f32 %v1407_v37, %v2806_v31  ;;  %v1413_v4 = vpop.f32.mrb[40].mxu0 }
 0x401   : > { %v2316_v5 = vpop.eup %2315  ;;  %v1632_v6 = vmul.f32 0.5, %v2314_v63  ;;  %v1573_v7 = vmul.f32 0.5, %v1541_v60  ;;  %v1543_v8 = vadd.f32 0.5, %v1511_v61  ;;  %2329 = vtanh.f32 %v1452_v62  ;;  %v1415_v50 = vpop.f32.mrb[41].mxu0 }
 0x402   : > { %v1574_v9 = vmul.f32 0.5, %v1542_v0  ;;  %v1544_v10 = vadd.f32 0.5, %v1512_v1  ;;  %v1513_v11 = vmul.f32 0.5, %v2316_v5  ;;  %2331 = vtanh.f32 %v1453_v2  ;;  %v1417_v12 = vpop.f32.mrb[42].mxu0 }
 0x403   : > { %v1664_v13 = vadd.f32 0.5, %v1632_v6  ;;  %2333 = vtanh.f32 %v1573_v7  ;;  %v1575_v14 = vmul.f32 0.5, %v1543_v8  ;;  %v1454_v15 = vmul.f32 0.5, %v1408_v3  ;;  %v1419_v59 = vpop.f32.mrb[43].mxu0 }
 0x404   : > { %v2318_v16 = vpop.eup %2317  ;;  %2335 = vtanh.f32 %v1574_v9  ;;  %v1576_v17 = vmul.f32 0.5, %v1544_v10  ;;  %v1545_v18 = vadd.f32 0.5, %v1513_v11  ;;  %v1410_v19 = vadd.f32 %v1409_v45, %v2808_v32 }
 0x405   : > { %v2320_v20 = vpop.eup %2319  ;;  %1696 = vst [vmem:[%s2834_s17 + $0x40] sm:$0xff] %v1664_v13  ;;  %2337 = vtanh.f32 %v1575_v14  ;;  %v1514_v21 = vmul.f32 0.5, %v2318_v16  ;;  %v1414_v22 = vadd.f32 %v1413_v4, %v2806_v31  ;;  %v1416_v23 = vadd.f32 %v1415_v50, %v2808_v32 }
 0x406   : > { %v2322_v24 = vpop.eup %2321  ;;  %v1633_v25 = vmul.f32 0.5, %v2320_v20  ;;  %2339 = vtanh.f32 %v1576_v17  ;;  %v1577_v26 = vmul.f32 0.5, %v1545_v18  ;;  %v1455_v27 = vmul.f32 0.5, %v1410_v19 }
 0x407   : > { %v2324_v28 = vpop.eup %2323  ;;  %v1634_v29 = vmul.f32 0.5, %v2322_v24  ;;  %v1546_v30 = vadd.f32 0.5, %v1514_v21  ;;  %2341 = vtanh.f32 %v1454_v15  ;;  %v1456_v42 = vmul.f32 0.5, %v1414_v22 }
 0x408   : > { %v2326_v33 = vpop.eup %2325  ;;  %v1665_v34 = vadd.f32 0.5, %v1633_v25  ;;  %v1635_v35 = vmul.f32 0.5, %v2324_v28  ;;  %2343 = vtanh.f32 %v1577_v26  ;;  %v1457_v36 = vmul.f32 0.5, %v1416_v23  ;;  %v1423_v49 = vpop.f32.mrb[44].mxu0 }
 0x409   : > { %v2328_v37 = vpop.eup %2327  ;;  %v1666_v38 = vadd.f32 0.5, %v1634_v29  ;;  %v1636_v39 = vmul.f32 0.5, %v2326_v33  ;;  %v1578_v41 = vmul.f32 0.5, %v1546_v30  ;;  %2345 = vtanh.f32 %v1455_v27  ;;  %v1425_v43 = vpop.f32.mrb[45].mxu0 }
 0x40a   : > { %1697 = vst [vmem:[%s2834_s17 + $0x48] sm:$0xff] %v1665_v34  ;;  %v1667_v45 = vadd.f32 0.5, %v1635_v35  ;;  %v1515_v46 = vmul.f32 0.5, %v2328_v37  ;;  %2347 = vtanh.f32 %v1456_v42  ;;  %v1418_v47 = vadd.f32 %v1417_v12, %v2806_v31  ;;  %v1427_v48 = vpop.f32.mrb[46].mxu0 }
 0x40b   : > { %v2330_v40 = vpop.eup %2329  ;;  %1698 = vst [vmem:[%s2834_s17 + $0x50] sm:$0xff] %v1666_v38  ;;  %v1668_v52 = vadd.f32 0.5, %v1636_v39  ;;  %2349 = vtanh.f32 %v1578_v41  ;;  %v1420_v53 = vadd.f32 %v1419_v59, %v2808_v32  ;;  %v1424_v54 = vadd.f32 %v1423_v49, %v2806_v31  ;;  %v1429_v55 = vpop.f32.mrb[47].mxu0 }
 0x40c   : > { %v2332_v44 = vpop.eup %2331  ;;  %1699 = vst [vmem:[%s2834_s17 + $0x58] sm:$0xff] %v1667_v45  ;;  %v1547_v51 = vadd.f32 0.5, %v1515_v46  ;;  %v1516_v56 = vmul.f32 0.5, %v2330_v40  ;;  %2351 = vtanh.f32 %v1457_v36  ;;  %v1458_v57 = vmul.f32 0.5, %v1418_v47 }
 0x40d   : > { %v2334_v58 = vpop.eup %2333  ;;  %1700 = vst [vmem:[%s2834_s17 + $0x60] sm:$0xff] %v1668_v52  ;;  %v1517_v60 = vmul.f32 0.5, %v2332_v44  ;;  %v1459_v61 = vmul.f32 0.5, %v1420_v53  ;;  %v1460_v62 = vmul.f32 0.5, %v1424_v54  ;;  %v1426_v63 = vadd.f32 %v1425_v43, %v2808_v32 }
 0x40e   : > { %v2336_v0 = vpop.eup %2335  ;;  %v1637_v1 = vmul.f32 0.5, %v2334_v58  ;;  %v1579_v2 = vmul.f32 0.5, %v1547_v51  ;;  %v1548_v3 = vadd.f32 0.5, %v1516_v56  ;;  %2353 = vtanh.f32 %v1458_v57 }
 0x40f   : > { %v2338_v4 = vpop.eup %2337  ;;  %v1638_v5 = vmul.f32 0.5, %v2336_v0  ;;  %v1549_v6 = vadd.f32 0.5, %v1517_v60  ;;  %2355 = vtanh.f32 %v1459_v61  ;;  %v1461_v7 = vmul.f32 0.5, %v1426_v63 }
 0x410   : > { %v2340_v8 = vpop.eup %2339  ;;  %v1669_v50 = vadd.f32 0.5, %v1637_v1  ;;  %v1639_v9 = vmul.f32 0.5, %v2338_v4  ;;  %2357 = vtanh.f32 %v1579_v2  ;;  %v1580_v10 = vmul.f32 0.5, %v1548_v3 }
 0x411   : > { %v2342_v11 = vpop.eup %2341  ;;  %v1670_v12 = vadd.f32 0.5, %v1638_v5  ;;  %v1640_v13 = vmul.f32 0.5, %v2340_v8  ;;  %v1581_v14 = vmul.f32 0.5, %v1549_v6  ;;  %2359 = vtanh.f32 %v1460_v62 }
 0x412   : > { %v2344_v15 = vpop.eup %2343  ;;  %1701 = vst [vmem:[%s2834_s17 + $0x68] sm:$0xff] %v1669_v50  ;;  %v1671_v59 = vadd.f32 0.5, %v1639_v9  ;;  %2361 = vtanh.f32 %v1580_v10  ;;  %v1518_v16 = vmul.f32 0.5, %v2342_v11  ;;  %v1428_v17 = vadd.f32 %v1427_v48, %v2806_v31 }
 0x413   : > { %v2346_v18 = vpop.eup %2345  ;;  %1702 = vst [vmem:[%s2834_s17 + $0x70] sm:$0xff] %v1670_v12  ;;  %v1672_v19 = vadd.f32 0.5, %v1640_v13  ;;  %v1641_v20 = vmul.f32 0.5, %v2344_v15  ;;  %2363 = vtanh.f32 %v1581_v14  ;;  %v1430_v21 = vadd.f32 %v1429_v55, %v2808_v32 }
 0x414   : > { %v2348_v22 = vpop.eup %2347  ;;  %1703 = vst [vmem:[%s2834_s17 + $0x78] sm:$0xff] %v1671_v59  ;;  %v1550_v23 = vadd.f32 0.5, %v1518_v16  ;;  %v1519_v24 = vmul.f32 0.5, %v2346_v18  ;;  %2365 = vtanh.f32 %v1461_v7  ;;  %v1462_v25 = vmul.f32 0.5, %v1428_v17 }
 0x415   : > { %v2350_v26 = vpop.eup %2349  ;;  %1704 = vst [vmem:[%s2834_s17 + $0x80] sm:$0xff] %v1672_v19  ;;  %v1673_v27 = vadd.f32 0.5, %v1641_v20  ;;  %v1520_v28 = vmul.f32 0.5, %v2348_v22  ;;  %v1463_v29 = vmul.f32 0.5, %v1430_v21 }
 0x416   : > { %v2352_v31 = vpop.eup %2351  ;;  %v1642_v30 = vmul.f32 0.5, %v2350_v26  ;;  %v1582_v42 = vmul.f32 0.5, %v1550_v23  ;;  %v1551_v33 = vadd.f32 0.5, %v1519_v24  ;;  %2367 = vtanh.f32 %v1462_v25 }
 0x417   : > { %1705 = vst [vmem:[%s2834_s17 + $0x88] sm:$0xff] %v1673_v27  ;;  %v1552_v32 = vadd.f32 0.5, %v1520_v28  ;;  %v1521_v34 = vmul.f32 0.5, %v2352_v31  ;;  %2369 = vtanh.f32 %v1463_v29 }
 0x418   : > { %v2354_v35 = vpop.eup %2353  ;;  %v1674_v36 = vadd.f32 0.5, %v1642_v30  ;;  %2371 = vtanh.f32 %v1582_v42  ;;  %v1583_v49 = vmul.f32 0.5, %v1551_v33 }
 0x419   : > { %v2356_v37 = vpop.eup %2355  ;;  %v1584_v38 = vmul.f32 0.5, %v1552_v32  ;;  %v1553_v39 = vadd.f32 0.5, %v1521_v34  ;;  %v1522_v41 = vmul.f32 0.5, %v2354_v35 }
 0x41a   : > { %v2358_v43 = vpop.eup %2357  ;;  %1706 = vst [vmem:[%s2834_s17 + $0x90] sm:$0xff] %v1674_v36  ;;  %2373 = vtanh.f32 %v1583_v49  ;;  %v1523_v45 = vmul.f32 0.5, %v2356_v37 }
 0x41b   : > { %v2360_v46 = vpop.eup %2359  ;;  %v1643_v47 = vmul.f32 0.5, %v2358_v43  ;;  %2375 = vtanh.f32 %v1584_v38  ;;  %v1585_v48 = vmul.f32 0.5, %v1553_v39  ;;  %v1554_v40 = vadd.f32 0.5, %v1522_v41 }
 0x41c   : > { %v2362_v52 = vpop.eup %2361  ;;  %v1555_v53 = vadd.f32 0.5, %v1523_v45  ;;  %v1524_v54 = vmul.f32 0.5, %v2360_v46 }
 0x41d   : > { %v2364_v55 = vpop.eup %2363  ;;  %v1675_v44 = vadd.f32 0.5, %v1643_v47  ;;  %v1644_v51 = vmul.f32 0.5, %v2362_v52  ;;  %2377 = vtanh.f32 %v1585_v48  ;;  %v1586_v56 = vmul.f32 0.5, %v1554_v40 }
 0x41e   : > { %v2366_v57 = vpop.eup %2365  ;;  %v1645_v58 = vmul.f32 0.5, %v2364_v55  ;;  %v1587_v60 = vmul.f32 0.5, %v1555_v53  ;;  %v1556_v61 = vadd.f32 0.5, %v1524_v54 }
 0x41f   : > { %1707 = vst [vmem:[%s2834_s17 + $0x98] sm:$0xff] %v1675_v44  ;;  %v1676_v62 = vadd.f32 0.5, %v1644_v51  ;;  %2379 = vtanh.f32 %v1586_v56  ;;  %v1525_v63 = vmul.f32 0.5, %v2366_v57 }
 0x420   : > { %v2368_v0 = vpop.eup %2367  ;;  %v1677_v1 = vadd.f32 0.5, %v1645_v58  ;;  %2381 = vtanh.f32 %v1587_v60  ;;  %v1588_v2 = vmul.f32 0.5, %v1556_v61 }
 0x421   : > { %v2370_v3 = vpop.eup %2369  ;;  %1708 = vst [vmem:[%s2834_s17 + $0xa0] sm:$0xff] %v1676_v62  ;;  %v1557_v4 = vadd.f32 0.5, %v1525_v63  ;;  %v1526_v5 = vmul.f32 0.5, %v2368_v0 }
 0x422   : > { %v2372_v6 = vpop.eup %2371  ;;  %1709 = vst [vmem:[%s2834_s17 + $0xa8] sm:$0xff] %v1677_v1  ;;  %2383 = vtanh.f32 %v1588_v2  ;;  %v1527_v7 = vmul.f32 0.5, %v2370_v3 }
 0x423   : > { %v1646_v8 = vmul.f32 0.5, %v2372_v6  ;;  %v1589_v50 = vmul.f32 0.5, %v1557_v4  ;;  %v1558_v9 = vadd.f32 0.5, %v1526_v5 }
 0x424   : > { %v2374_v10 = vpop.eup %2373  ;;  %v1559_v11 = vadd.f32 0.5, %v1527_v7 }
 0x425   : > { %v2376_v12 = vpop.eup %2375  ;;  %v1678_v13 = vadd.f32 0.5, %v1646_v8  ;;  %v1647_v14 = vmul.f32 0.5, %v2374_v10  ;;  %2385 = vtanh.f32 %v1589_v50  ;;  %v1590_v15 = vmul.f32 0.5, %v1558_v9 }
 0x426   : > { %v1648_v59 = vmul.f32 0.5, %v2376_v12  ;;  %v1591_v16 = vmul.f32 0.5, %v1559_v11 }
 0x427   : > { %v2378_v17 = vpop.eup %2377  ;;  %1710 = vst [vmem:[%s2834_s17 + $0xb0] sm:$0xff] %v1678_v13  ;;  %v1679_v18 = vadd.f32 0.5, %v1647_v14  ;;  %2387 = vtanh.f32 %v1590_v15 }
 0x428   : > { %v1680_v19 = vadd.f32 0.5, %v1648_v59  ;;  %v1649_v20 = vmul.f32 0.5, %v2378_v17  ;;  %2389 = vtanh.f32 %v1591_v16 }
 0x429   : > { %v2380_v21 = vpop.eup %2379  ;;  %1711 = vst [vmem:[%s2834_s17 + $0xb8] sm:$0xff] %v1679_v18 }
 0x42a   : > { %v2382_v22 = vpop.eup %2381  ;;  %1712 = vst [vmem:[%s2834_s17 + $0xc0] sm:$0xff] %v1680_v19  ;;  %v1681_v23 = vadd.f32 0.5, %v1649_v20  ;;  %v1650_v24 = vmul.f32 0.5, %v2380_v21 }
 0x42b   : > { %v1651_v25 = vmul.f32 0.5, %v2382_v22 }
 0x42c   : > { %v2384_v26 = vpop.eup %2383  ;;  %1713 = vst [vmem:[%s2834_s17 + $0xc8] sm:$0xff] %v1681_v23  ;;  %v1682_v27 = vadd.f32 0.5, %v1650_v24 }
 0x42d   : > { %v1683_v28 = vadd.f32 0.5, %v1651_v25  ;;  %v1652_v29 = vmul.f32 0.5, %v2384_v26 }
 0x42e   : > { %1714 = vst [vmem:[%s2834_s17 + $0xd0] sm:$0xff] %v1682_v27 }
 0x42f   : > { %v2386_v31 = vpop.eup %2385  ;;  %1715 = vst [vmem:[%s2834_s17 + $0xd8] sm:$0xff] %v1683_v28  ;;  %v1684_v30 = vadd.f32 0.5, %v1652_v29 }
 0x430   : > { %v1653_v42 = vmul.f32 0.5, %v2386_v31 }
 0x431   : > { %v2388_v33 = vpop.eup %2387  ;;  %1716 = vst [vmem:[%s2834_s17 + $0xe0] sm:$0xff] %v1684_v30 }
 0x432   : > { %v2390_v32 = vpop.eup %2389  ;;  %v1685_v34 = vadd.f32 0.5, %v1653_v42  ;;  %v1654_v35 = vmul.f32 0.5, %v2388_v33 }
 0x433   : > { %v1655_v36 = vmul.f32 0.5, %v2390_v32 }
 0x434   : > { %1717 = vst [vmem:[%s2834_s17 + $0xe8] sm:$0xff] %v1685_v34  ;;  %v1686_v49 = vadd.f32 0.5, %v1654_v35 }
 0x435   : > { %v1687_v37 = vadd.f32 0.5, %v1655_v36 }
 0x436   : > { %1718 = vst [vmem:[%s2834_s17 + $0xf0] sm:$0xff] %v1686_v49 }
 0x437   : > { %1719 = vst [vmem:[%s2834_s17 + $0xf8] sm:$0xff] %v1687_v37 }
 0x438   : > { %2404 = shalt.err (!%p2401_p3)
}
 0x439   : > { %s2405_s28 = scalar_lea.hbm %s2885_s23, 4096  ;;  %s2409_s14 = scalar_lea.hbm %s2943_s9, 8192 }
 0x43a   : > { %p2406_p4 = scmp.ne.s32.totalorder %s2885_s23, %s2405_s28  ;;  %p2410_p9 = scmp.lt.u32.totalorder %s2885_s23, %s2943_s9 }
 0x43b   : > { %p2411_p10 = scmp.lt.u32.totalorder %s2409_s14, %s2405_s28  ;;  %p2413_p12 = scmp.lt.u32.totalorder %s2405_s28, %s2885_s23 }
 0x43c   : > { %p2407_p7 = pnand %p2406_p4, %p2547_p5 }
 0x43d   : > { %p2412_p11 = por %p2411_p10, %p2410_p9 }
 0x43e   : > { %p2408_p8 = pneg %p2407_p7 }
 0x43f   : > { %p2414_p13 = por %p2413_p12, %p2412_p11 }
 0x441   : > { %p2415_p0 = pnand %p2414_p13, %p2408_p8 }
 0x443   : > { %2418 = shalt.err (!%p2415_p0)
}
 0x444   : > { %s2457_s24 = smov 256   ;;  %s2458_s25 = smov 16  }
 0x445   : > { %2049 = dma.vmem_to_hbm [thread:$0]  (%p2547_p5), %s2887_s16, 4096, %s2885_s23, %s2893_s13, %s2457_s24, %s2457_s24, %s2458_s25  }
 0x446 PF: > { %p2055_p1 = scmp.ge.s32.totalorder %s2453_s12, 2  ;;  %s1750_s26 = sand.u32 1, %s2441_s30  }
 0x447   : > { %s1751_s27 = scalar_lea.sflag [#allocation3], %s1750_s26 }
 0x448   : > { %p2052_p2 = pnand %p2055_p1, %p2551_p6 }
 0x44a   : > { %2436 = dma.done.wait (!%p2052_p2), %s1751_s27, 4096  }
 0x44b   : > { %2438 = vsyncadd (!%p2052_p2), %s1751_s27, 4294963200  ;;  %p19_p3 = scmp.ge.s32.totalorder %s2534_s15, 4   ;;  %s2946_s30 = smov %s2445_s10 }
 0x44c   : > { %s2947_s10 = smov %s2449_s11  ;;  %s2948_s11 = smov %s2545_s18 }
 0x44d   : > { %s2949_s12 = smov %s2534_s15  ;;  %21 = sbr.rel (!%p19_p3) target bundleno = 3 (0x3), region = 91 }
 0x454   :  { %1756 = vsyncpa [#allocation3], 1 }
 0x455   :  { %1758 = vsyncpa [#allocation3 + $0x1], 1 }

</bundles_post_ra>
